<compile_context>
chip_gen: v6e
topology: v6e:2x2x1
jax: 0.10.0
libtpu: 0.0.40
codegen_flags: <defaults>
</compile_context>

<pallas_src>
import functools

import jax
import jax.numpy as jnp
from jax.experimental import pallas as pl
from jax.experimental.pallas import tpu as pltpu

EPS = 1e-5
NEG_SLOPE = 0.2
_LANE = 128      # TPU lane width
_SUBLANE = 8     # f32 sublane tile


def _round_up(v, m):
    return (v + m - 1) // m * m


def _conv3x3_in_lrelu(x, w, keep_m1, keep_p1, H, W):
    """3x3 conv (pad=1, no bias) + InstanceNorm2d + LeakyReLU(0.2).

    x:       (C_pad, H*W) f32 lane-dense activation (channels padded to 8-multiple).
    w:       (C_out, 9*C_pad) im2col weights, contraction ordered (ky, kx, channel);
             dtype = MXU operand dtype (bf16 by default, f32 optional).
    keep_m1: (1, H*W) bool, False exactly at source column W-1 (kills the row
             wrap-around reads of the dx=-1 taps).
    keep_p1: (1, H*W) bool, False exactly at source column 0 (dx=+1 taps).
    returns  (C_out, H*W) float32.
    """
    HW = H * W
    C = x.shape[0]

    # Lane-aligned zero border: every dy-out-of-range read (top/bottom image rows)
    # lands in these slabs and comes back as zero -> no row masks needed.
    border = _round_up(W + 1, _LANE)
    zb = jnp.zeros((C, border), jnp.float32)

    # Column-killed source copies: zeroing the wrap-around source column makes all
    # dx=+-1 taps plain static lane slices with no per-tap select.
    x_m1 = jnp.where(keep_m1, x, 0.0)   # used by dx = -1 taps
    x_p1 = jnp.where(keep_p1, x, 0.0)   # used by dx = +1 taps

    padded = {
        -1: jnp.concatenate([zb, x_m1, zb], axis=1),
        0:  jnp.concatenate([zb, x,    zb], axis=1),
        1:  jnp.concatenate([zb, x_p1, zb], axis=1),
    }

    pieces = []
    for ky in range(3):
        dy = ky - 1
        for kx in range(3):
            dx = kx - 1
            off = border + dy * W + dx
            pieces.append(padded[dx][:, off: off + HW])   # (C, HW), static slice
    patches = jnp.concatenate(pieces, axis=0)             # (9*C, HW), tile-aligned

    # Single MXU contraction: (C_out, 9*C) x (9*C, HW) -> (C_out, HW), f32 acc.
    # TODO(synk): at large C/HW split into three per-ky dots (K=3*C live at a time)
    # to cut peak patch VMEM ~3x for v7x's 64 MiB budget.
    y = jnp.dot(w, patches.astype(w.dtype), preferred_element_type=jnp.float32)

    # One-pass InstanceNorm2d: biased variance, eps inside rsqrt, no affine.
    inv_hw = 1.0 / HW
    mean = jnp.sum(y, axis=1, keepdims=True) * inv_hw
    var = jnp.sum(y * y, axis=1, keepdims=True) * inv_hw - mean * mean
    var = jnp.maximum(var, 0.0)                          # guard E[y^2]-mean^2 rounding
    y = (y - mean) * jax.lax.rsqrt(var + EPS)

    # LeakyReLU(0.2) without a compare+select.
    return jnp.maximum(y, NEG_SLOPE * y)


def _block_kernel(x_ref, w1_ref, w2_ref, o_ref, *, H, W):
    # x_ref : (nb, Cin_pad, H*W)       nb batch elements, lane-dense
    # w1_ref: (Cmid_pad, 9*Cin_pad)    stage-1 im2col weights (bf16 or f32)
    # w2_ref: (Cout,     9*Cmid_pad)   stage-2 im2col weights
    # o_ref : (nb, Cout, H*W)
    HW = H * W
    nb = x_ref.shape[0]

    # Column coordinates / wrap-kill masks: computed once, shared by both stages
    # and all batch elements in this grid step.
    idx = jax.lax.broadcasted_iota(jnp.int32, (1, HW), 1)
    col = (idx & (W - 1)) if (W & (W - 1)) == 0 else idx % W
    keep_m1 = col != (W - 1)
    keep_p1 = col != 0

    w1 = w1_ref[...]
    w2 = w2_ref[...]

    for n in range(nb):                                   # static unroll (nb is tiny)
        x = x_ref[n].astype(jnp.float32)                  # (Cin_pad, HW)
        y = _conv3x3_in_lrelu(x, w1, keep_m1, keep_p1, H, W)
        y = _conv3x3_in_lrelu(y, w2, keep_m1, keep_p1, H, W)
        # TODO(synk): Dropout2d is identity at inference; training-mode channel
        # dropout would use pltpu.prng_seed / pltpu.prng_random_bits here.
        o_ref[n] = y.astype(o_ref.dtype)


def prepare_weights(w1_oihw, w2_oihw, compute_dtype=jnp.bfloat16):
    """One-time prep: OIHW conv weights -> MXU-ready im2col layout.

    Returns (w1_i2c, w2_i2c):
      w1_i2c: (Cmid_pad, 9 * Cin_pad)   dtype = compute_dtype (bf16 default)
      w2_i2c: (Cout,     9 * Cmid_pad)
    Channel dims are zero-padded to multiples of 8 so every in-kernel concatenation
    is tile-aligned; zero rows/cols are numerically inert.
    """
    c_mid, c_in = w1_oihw.shape[:2]
    c_out = w2_oihw.shape[0]
    c_in_pad = _round_up(c_in, _SUBLANE)
    c_mid_pad = _round_up(c_mid, _SUBLANE)

    def im2col(w, c_o_pad, c_i_pad):
        c_o, c_i, kh, kw = w.shape
        w = jnp.transpose(w, (0, 2, 3, 1)).astype(jnp.float32)   # (Co, kh, kw, Ci)
        w = jnp.pad(w, ((0, c_o_pad - c_o), (0, 0), (0, 0), (0, c_i_pad - c_i)))
        return w.reshape(c_o_pad, kh * kw * c_i_pad).astype(compute_dtype)

    return im2col(w1_oihw, c_mid_pad, c_in_pad), im2col(w2_oihw, c_out, c_mid_pad)


def _default_batch_per_step(n):
    """v7x (2 TensorCores/chip): 1 element per grid step so the 'parallel' grid
    axis shards batch elements across cores.  Single-TC chips (v5e/v6e): fold the
    whole batch into one grid step (the grid would just be a serial loop)."""
    try:
        kind = jax.devices()[0].device_kind.lower()
    except Exception:
        kind = ""
    return 1 if "v7" in kind else n


def convolution_block_im2col(x, w1_i2c, w2_i2c, *, batch_per_step=None):
    """Fused ConvolutionBlock forward with pre-packed im2col weights."""
    N, c_in, H, W = x.shape
    HW = H * W
    c_in_pad = w1_i2c.shape[1] // 9
    c_mid_pad = w1_i2c.shape[0]
    c_out = w2_i2c.shape[0]
    assert w2_i2c.shape[1] == 9 * c_mid_pad
    assert c_in_pad >= c_in

    if batch_per_step is None:
        batch_per_step = _default_batch_per_step(N)
    batch_per_step = max(1, min(int(batch_per_step), N))
    if N % batch_per_step:
        batch_per_step = 1
    num_steps = N // batch_per_step

    # Lane-dense (N, C, H*W); free reshape + a few-KiB channel pad keeping all
    # in-kernel sublane concatenations on the 8-row tile.
    x_flat = x.reshape(N, c_in, HW)
    if c_in_pad != c_in:
        x_flat = jnp.pad(x_flat, ((0, 0), (0, c_in_pad - c_in), (0, 0)))

    kernel = functools.partial(_block_kernel, H=H, W=W)
    out = pl.pallas_call(
        kernel,
        out_shape=jax.ShapeDtypeStruct((N, c_out, HW), x.dtype),
        grid=(num_steps,),
        in_specs=[
            pl.BlockSpec((batch_per_step, c_in_pad, HW), lambda n: (n, 0, 0)),
            # Weight blocks are grid-invariant; at large channel counts they could
            # be single-buffered or kept resident in scratch to halve their VMEM.
            pl.BlockSpec((c_mid_pad, 9 * c_in_pad), lambda n: (0, 0)),
            pl.BlockSpec((c_out, 9 * c_mid_pad), lambda n: (0, 0)),
        ],
        out_specs=pl.BlockSpec((batch_per_step, c_out, HW), lambda n: (n, 0, 0)),
        compiler_params=pltpu.CompilerParams(
            dimension_semantics=("parallel",),       # v7x: one batch element per TC
            vmem_limit_bytes=48 * 1024 * 1024,       # explicit; safe on v5e..v7x
        ),
    )(x_flat, w1_i2c, w2_i2c)
    return out.reshape(N, c_out, H, W)


def convolution_block(x, w1_oihw, w2_oihw, *, compute_dtype=jnp.bfloat16,
                      batch_per_step=None):
    """Full ConvolutionBlock forward (inference) from PyTorch OIHW weights."""
    w1_i2c, w2_i2c = prepare_weights(w1_oihw, w2_oihw, compute_dtype=compute_dtype)
    return convolution_block_im2col(x, w1_i2c, w2_i2c, batch_per_step=batch_per_step)


# ----------------------------- reference (plain JAX) -----------------------------
def _ref_stage(x, w_oihw):
    y = jax.lax.conv_general_dilated(
        x, w_oihw, window_strides=(1, 1), padding=[(1, 1), (1, 1)],
        dimension_numbers=("NCHW", "OIHW", "NCHW"))
    mean = y.mean(axis=(2, 3), keepdims=True)
    var = jnp.square(y - mean).mean(axis=(2, 3), keepdims=True)
    y = (y - mean) * jax.lax.rsqrt(var + EPS)
    return jnp.where(y >= 0, y, NEG_SLOPE * y)


def _ref_block(x, w1, w2):
    return _ref_stage(_ref_stage(x, w1), w2)


if __name__ == "__main__":
    # Small shapes consistent with the module: batch=2, input_dim=4, output_dim=8,
    # spatial 16x16.
    N, C_IN, C_OUT, H, W = 2, 4, 8, 16, 16

    key = jax.random.PRNGKey(0)
    kx, kw1, kw2 = jax.random.split(key, 3)
    x = jax.random.normal(kx, (N, C_IN, H, W), dtype=jnp.float32)
    # Deterministic synthetic weights (OIHW, like torch.nn.Conv2d.weight).
    w1 = jax.random.normal(kw1, (C_OUT, C_IN, 3, 3), dtype=jnp.float32) * 0.1
    w2 = jax.random.normal(kw2, (C_OUT, C_OUT, 3, 3), dtype=jnp.float32) * 0.1

    ref = jax.block_until_ready(_ref_block(x, w1, w2))

    # Strict correctness gate: f32 MXU operands vs the f32 reference.
    out_f32 = jax.block_until_ready(
        jax.jit(functools.partial(convolution_block, compute_dtype=jnp.float32))(
            x, w1, w2))
    assert out_f32.shape == (N, C_OUT, H, W), out_f32.shape
    err_f32 = float(jnp.max(jnp.abs(out_f32 - ref)))
    assert jnp.allclose(out_f32, ref, atol=1e-3, rtol=1e-3), err_f32

    # Default path: bf16 MXU operands with f32 accumulation; InstanceNorm amplifies
    # the operand rounding a little, so the tolerance is loosened accordingly.
    out_bf16 = jax.block_until_ready(jax.jit(convolution_block)(x, w1, w2))
    assert out_bf16.shape == (N, C_OUT, H, W), out_bf16.shape
    err_bf16 = float(jnp.max(jnp.abs(out_bf16 - ref)))
    assert jnp.allclose(out_bf16, ref, atol=5e-2, rtol=5e-2), err_bf16

    print("KERNEL_OK")
</pallas_src>

<mosaic_0001>
module attributes {stable_mosaic.version = 11 : i64} {
  func.func @_block_kernel(%arg0: i32, %arg1: memref<2x8x256xf32, #tpu.memory_space<vmem>>, %arg2: memref<8x72xf32, #tpu.memory_space<vmem>>, %arg3: memref<8x72xf32, #tpu.memory_space<vmem>>, %arg4: memref<2x8x256xf32, #tpu.memory_space<vmem>>) attributes {dimension_semantics = [#tpu.dimension_semantics<parallel>], iteration_bounds = array<i64: 1>, scalar_prefetch = 0 : i64, scratch_operands = 0 : i64, tpu.core_type = #tpu.core_type<tc>, window_params = [{transform_indices = @transform_0, window_bounds = array<i64: 2, 8, 256>}, {pipeline_mode = #tpu.pipeline_mode<synchronous>, transform_indices = @transform_1, window_bounds = array<i64: 8, 72>}, {pipeline_mode = #tpu.pipeline_mode<synchronous>, transform_indices = @transform_2, window_bounds = array<i64: 8, 72>}, {transform_indices = @transform_3, window_bounds = array<i64: 2, 8, 256>}]} {
    %0 = tpu.iota {dimensions = array<i32: 1>} : vector<1x256xi32>
    %c15_i32 = arith.constant 15 : i32
    %1 = vector.broadcast %c15_i32 : i32 to vector<1x256xi32>
    %2 = arith.andi %0, %1 : vector<1x256xi32>
    %c15_i32_0 = arith.constant 15 : i32
    %3 = vector.broadcast %c15_i32_0 : i32 to vector<1x256xi32>
    %4 = arith.cmpi ne, %2, %3 : vector<1x256xi32>
    %c0_i32 = arith.constant 0 : i32
    %5 = vector.broadcast %c0_i32 : i32 to vector<1x256xi32>
    %6 = arith.cmpi ne, %2, %5 : vector<1x256xi32>
    %c0 = arith.constant 0 : index
    %c0_1 = arith.constant 0 : index
    %7 = vector.load %arg2[%c0, %c0_1] : memref<8x72xf32, #tpu.memory_space<vmem>>, vector<8x72xf32>
    %c0_2 = arith.constant 0 : index
    %c0_3 = arith.constant 0 : index
    %8 = vector.load %arg3[%c0_2, %c0_3] : memref<8x72xf32, #tpu.memory_space<vmem>>, vector<8x72xf32>
    %c0_4 = arith.constant 0 : index
    %c0_5 = arith.constant 0 : index
    %c0_6 = arith.constant 0 : index
    %9 = vector.load %arg1[%c0_4, %c0_5, %c0_6] : memref<2x8x256xf32, #tpu.memory_space<vmem>>, vector<1x8x256xf32>
    %10 = vector.shape_cast %9 : vector<1x8x256xf32> to vector<8x256xf32>
    %cst = arith.constant 0.000000e+00 : f32
    %11 = vector.broadcast %cst : f32 to vector<8x128xf32>
    %cst_7 = arith.constant 0.000000e+00 : f32
    %12 = vector.shape_cast %4 : vector<1x256xi1> to vector<1x256xi1>
    %13 = vector.broadcast %12 : vector<1x256xi1> to vector<8x256xi1>
    %14 = vector.broadcast %cst_7 : f32 to vector<8x256xf32>
    %15 = arith.select %13, %10, %14 : vector<8x256xi1>, vector<8x256xf32>
    %cst_8 = arith.constant 0.000000e+00 : f32
    %16 = vector.shape_cast %6 : vector<1x256xi1> to vector<1x256xi1>
    %17 = vector.broadcast %16 : vector<1x256xi1> to vector<8x256xi1>
    %18 = vector.broadcast %cst_8 : f32 to vector<8x256xf32>
    %19 = arith.select %17, %10, %18 : vector<8x256xi1>, vector<8x256xf32>
    %20 = tpu.concatenate %11, %15, %11 in 1 : vector<8x128xf32>, vector<8x256xf32>, vector<8x128xf32> -> vector<8x512xf32>
    %21 = tpu.concatenate %11, %10, %11 in 1 : vector<8x128xf32>, vector<8x256xf32>, vector<8x128xf32> -> vector<8x512xf32>
    %22 = tpu.concatenate %11, %19, %11 in 1 : vector<8x128xf32>, vector<8x256xf32>, vector<8x128xf32> -> vector<8x512xf32>
    %23 = vector.extract_strided_slice %20 {offsets = [0, 111], sizes = [8, 256], strides = [1, 1]} : vector<8x512xf32> to vector<8x256xf32>
    %24 = vector.extract_strided_slice %21 {offsets = [0, 112], sizes = [8, 256], strides = [1, 1]} : vector<8x512xf32> to vector<8x256xf32>
    %25 = vector.extract_strided_slice %22 {offsets = [0, 113], sizes = [8, 256], strides = [1, 1]} : vector<8x512xf32> to vector<8x256xf32>
    %26 = vector.extract_strided_slice %20 {offsets = [0, 127], sizes = [8, 256], strides = [1, 1]} : vector<8x512xf32> to vector<8x256xf32>
    %27 = vector.extract_strided_slice %21 {offsets = [0, 128], sizes = [8, 256], strides = [1, 1]} : vector<8x512xf32> to vector<8x256xf32>
    %28 = vector.extract_strided_slice %22 {offsets = [0, 129], sizes = [8, 256], strides = [1, 1]} : vector<8x512xf32> to vector<8x256xf32>
    %29 = vector.extract_strided_slice %20 {offsets = [0, 143], sizes = [8, 256], strides = [1, 1]} : vector<8x512xf32> to vector<8x256xf32>
    %30 = vector.extract_strided_slice %21 {offsets = [0, 144], sizes = [8, 256], strides = [1, 1]} : vector<8x512xf32> to vector<8x256xf32>
    %31 = vector.extract_strided_slice %22 {offsets = [0, 145], sizes = [8, 256], strides = [1, 1]} : vector<8x512xf32> to vector<8x256xf32>
    %32 = tpu.concatenate %23, %24, %25, %26, %27, %28, %29, %30, %31 in 0 : vector<8x256xf32>, vector<8x256xf32>, vector<8x256xf32>, vector<8x256xf32>, vector<8x256xf32>, vector<8x256xf32>, vector<8x256xf32>, vector<8x256xf32>, vector<8x256xf32> -> vector<72x256xf32>
    %cst_9 = arith.constant dense<0.000000e+00> : vector<8x256xf32>
    %33 = tpu.matmul %7, %32, %cst_9 {dimension_numbers = #tpu.dot_dimension_numbers<[1], [0], [0], [1], [0, 0, 1, 1], [], []>} : vector<8x72xf32>, vector<72x256xf32>, vector<8x256xf32> -> vector<8x256xf32>
    %cst_10 = arith.constant dense<0.000000e+00> : vector<8xf32>
    %34 = vector.multi_reduction <add>, %33, %cst_10 [1] : vector<8x256xf32> to vector<8xf32>
    %35 = vector.shape_cast %34 : vector<8xf32> to vector<8x1xf32>
    %cst_11 = arith.constant 3.906250e-03 : f32
    %36 = vector.broadcast %cst_11 : f32 to vector<8x1xf32>
    %37 = arith.mulf %35, %36 : vector<8x1xf32>
    %38 = arith.mulf %33, %33 : vector<8x256xf32>
    %cst_12 = arith.constant dense<0.000000e+00> : vector<8xf32>
    %39 = vector.multi_reduction <add>, %38, %cst_12 [1] : vector<8x256xf32> to vector<8xf32>
    %40 = vector.shape_cast %39 : vector<8xf32> to vector<8x1xf32>
    %cst_13 = arith.constant 3.906250e-03 : f32
    %41 = vector.broadcast %cst_13 : f32 to vector<8x1xf32>
    %42 = arith.mulf %40, %41 : vector<8x1xf32>
    %43 = arith.mulf %37, %37 : vector<8x1xf32>
    %44 = arith.subf %42, %43 : vector<8x1xf32>
    %cst_14 = arith.constant 0.000000e+00 : f32
    %45 = vector.broadcast %cst_14 : f32 to vector<8x1xf32>
    %46 = arith.maximumf %44, %45 : vector<8x1xf32>
    %47 = vector.broadcast %37 : vector<8x1xf32> to vector<8x256xf32>
    %48 = arith.subf %33, %47 : vector<8x256xf32>
    %cst_15 = arith.constant 9.99999974E-6 : f32
    %49 = vector.broadcast %cst_15 : f32 to vector<8x1xf32>
    %50 = arith.addf %46, %49 : vector<8x1xf32>
    %51 = math.rsqrt %50 : vector<8x1xf32>
    %52 = vector.broadcast %51 : vector<8x1xf32> to vector<8x256xf32>
    %53 = arith.mulf %48, %52 : vector<8x256xf32>
    %cst_16 = arith.constant 2.000000e-01 : f32
    %54 = vector.broadcast %cst_16 : f32 to vector<8x256xf32>
    %55 = arith.mulf %54, %53 : vector<8x256xf32>
    %56 = arith.maximumf %53, %55 : vector<8x256xf32>
    %cst_17 = arith.constant 0.000000e+00 : f32
    %57 = vector.broadcast %cst_17 : f32 to vector<8x128xf32>
    %cst_18 = arith.constant 0.000000e+00 : f32
    %58 = vector.shape_cast %4 : vector<1x256xi1> to vector<1x256xi1>
    %59 = vector.broadcast %58 : vector<1x256xi1> to vector<8x256xi1>
    %60 = vector.broadcast %cst_18 : f32 to vector<8x256xf32>
    %61 = arith.select %59, %56, %60 : vector<8x256xi1>, vector<8x256xf32>
    %cst_19 = arith.constant 0.000000e+00 : f32
    %62 = vector.shape_cast %6 : vector<1x256xi1> to vector<1x256xi1>
    %63 = vector.broadcast %62 : vector<1x256xi1> to vector<8x256xi1>
    %64 = vector.broadcast %cst_19 : f32 to vector<8x256xf32>
    %65 = arith.select %63, %56, %64 : vector<8x256xi1>, vector<8x256xf32>
    %66 = tpu.concatenate %57, %61, %57 in 1 : vector<8x128xf32>, vector<8x256xf32>, vector<8x128xf32> -> vector<8x512xf32>
    %67 = tpu.concatenate %57, %56, %57 in 1 : vector<8x128xf32>, vector<8x256xf32>, vector<8x128xf32> -> vector<8x512xf32>
    %68 = tpu.concatenate %57, %65, %57 in 1 : vector<8x128xf32>, vector<8x256xf32>, vector<8x128xf32> -> vector<8x512xf32>
    %69 = vector.extract_strided_slice %66 {offsets = [0, 111], sizes = [8, 256], strides = [1, 1]} : vector<8x512xf32> to vector<8x256xf32>
    %70 = vector.extract_strided_slice %67 {offsets = [0, 112], sizes = [8, 256], strides = [1, 1]} : vector<8x512xf32> to vector<8x256xf32>
    %71 = vector.extract_strided_slice %68 {offsets = [0, 113], sizes = [8, 256], strides = [1, 1]} : vector<8x512xf32> to vector<8x256xf32>
    %72 = vector.extract_strided_slice %66 {offsets = [0, 127], sizes = [8, 256], strides = [1, 1]} : vector<8x512xf32> to vector<8x256xf32>
    %73 = vector.extract_strided_slice %67 {offsets = [0, 128], sizes = [8, 256], strides = [1, 1]} : vector<8x512xf32> to vector<8x256xf32>
    %74 = vector.extract_strided_slice %68 {offsets = [0, 129], sizes = [8, 256], strides = [1, 1]} : vector<8x512xf32> to vector<8x256xf32>
    %75 = vector.extract_strided_slice %66 {offsets = [0, 143], sizes = [8, 256], strides = [1, 1]} : vector<8x512xf32> to vector<8x256xf32>
    %76 = vector.extract_strided_slice %67 {offsets = [0, 144], sizes = [8, 256], strides = [1, 1]} : vector<8x512xf32> to vector<8x256xf32>
    %77 = vector.extract_strided_slice %68 {offsets = [0, 145], sizes = [8, 256], strides = [1, 1]} : vector<8x512xf32> to vector<8x256xf32>
    %78 = tpu.concatenate %69, %70, %71, %72, %73, %74, %75, %76, %77 in 0 : vector<8x256xf32>, vector<8x256xf32>, vector<8x256xf32>, vector<8x256xf32>, vector<8x256xf32>, vector<8x256xf32>, vector<8x256xf32>, vector<8x256xf32>, vector<8x256xf32> -> vector<72x256xf32>
    %cst_20 = arith.constant dense<0.000000e+00> : vector<8x256xf32>
    %79 = tpu.matmul %8, %78, %cst_20 {dimension_numbers = #tpu.dot_dimension_numbers<[1], [0], [0], [1], [0, 0, 1, 1], [], []>} : vector<8x72xf32>, vector<72x256xf32>, vector<8x256xf32> -> vector<8x256xf32>
    %cst_21 = arith.constant dense<0.000000e+00> : vector<8xf32>
    %80 = vector.multi_reduction <add>, %79, %cst_21 [1] : vector<8x256xf32> to vector<8xf32>
    %81 = vector.shape_cast %80 : vector<8xf32> to vector<8x1xf32>
    %cst_22 = arith.constant 3.906250e-03 : f32
    %82 = vector.broadcast %cst_22 : f32 to vector<8x1xf32>
    %83 = arith.mulf %81, %82 : vector<8x1xf32>
    %84 = arith.mulf %79, %79 : vector<8x256xf32>
    %cst_23 = arith.constant dense<0.000000e+00> : vector<8xf32>
    %85 = vector.multi_reduction <add>, %84, %cst_23 [1] : vector<8x256xf32> to vector<8xf32>
    %86 = vector.shape_cast %85 : vector<8xf32> to vector<8x1xf32>
    %cst_24 = arith.constant 3.906250e-03 : f32
    %87 = vector.broadcast %cst_24 : f32 to vector<8x1xf32>
    %88 = arith.mulf %86, %87 : vector<8x1xf32>
    %89 = arith.mulf %83, %83 : vector<8x1xf32>
    %90 = arith.subf %88, %89 : vector<8x1xf32>
    %cst_25 = arith.constant 0.000000e+00 : f32
    %91 = vector.broadcast %cst_25 : f32 to vector<8x1xf32>
    %92 = arith.maximumf %90, %91 : vector<8x1xf32>
    %93 = vector.broadcast %83 : vector<8x1xf32> to vector<8x256xf32>
    %94 = arith.subf %79, %93 : vector<8x256xf32>
    %cst_26 = arith.constant 9.99999974E-6 : f32
    %95 = vector.broadcast %cst_26 : f32 to vector<8x1xf32>
    %96 = arith.addf %92, %95 : vector<8x1xf32>
    %97 = math.rsqrt %96 : vector<8x1xf32>
    %98 = vector.broadcast %97 : vector<8x1xf32> to vector<8x256xf32>
    %99 = arith.mulf %94, %98 : vector<8x256xf32>
    %cst_27 = arith.constant 2.000000e-01 : f32
    %100 = vector.broadcast %cst_27 : f32 to vector<8x256xf32>
    %101 = arith.mulf %100, %99 : vector<8x256xf32>
    %102 = arith.maximumf %99, %101 : vector<8x256xf32>
    %c0_28 = arith.constant 0 : index
    %c0_29 = arith.constant 0 : index
    %c0_30 = arith.constant 0 : index
    %103 = vector.load %arg4[%c0_28, %c0_29, %c0_30] : memref<2x8x256xf32, #tpu.memory_space<vmem>>, vector<1x8x256xf32>
    %104 = vector.shape_cast %103 : vector<1x8x256xf32> to vector<8x256xf32>
    %105 = vector.shape_cast %102 : vector<8x256xf32> to vector<1x8x256xf32>
    tpu.vector_store %arg4[%c0_28, %c0_29, %c0_30], %105 {strides = array<i32>} : memref<2x8x256xf32, #tpu.memory_space<vmem>>, vector<1x8x256xf32>,
    %c1 = arith.constant 1 : index
    %c0_31 = arith.constant 0 : index
    %c0_32 = arith.constant 0 : index
    %106 = vector.load %arg1[%c1, %c0_31, %c0_32] : memref<2x8x256xf32, #tpu.memory_space<vmem>>, vector<1x8x256xf32>
    %107 = vector.shape_cast %106 : vector<1x8x256xf32> to vector<8x256xf32>
    %cst_33 = arith.constant 0.000000e+00 : f32
    %108 = vector.broadcast %cst_33 : f32 to vector<8x128xf32>
    %cst_34 = arith.constant 0.000000e+00 : f32
    %109 = vector.shape_cast %4 : vector<1x256xi1> to vector<1x256xi1>
    %110 = vector.broadcast %109 : vector<1x256xi1> to vector<8x256xi1>
    %111 = vector.broadcast %cst_34 : f32 to vector<8x256xf32>
    %112 = arith.select %110, %107, %111 : vector<8x256xi1>, vector<8x256xf32>
    %cst_35 = arith.constant 0.000000e+00 : f32
    %113 = vector.shape_cast %6 : vector<1x256xi1> to vector<1x256xi1>
    %114 = vector.broadcast %113 : vector<1x256xi1> to vector<8x256xi1>
    %115 = vector.broadcast %cst_35 : f32 to vector<8x256xf32>
    %116 = arith.select %114, %107, %115 : vector<8x256xi1>, vector<8x256xf32>
    %117 = tpu.concatenate %108, %112, %108 in 1 : vector<8x128xf32>, vector<8x256xf32>, vector<8x128xf32> -> vector<8x512xf32>
    %118 = tpu.concatenate %108, %107, %108 in 1 : vector<8x128xf32>, vector<8x256xf32>, vector<8x128xf32> -> vector<8x512xf32>
    %119 = tpu.concatenate %108, %116, %108 in 1 : vector<8x128xf32>, vector<8x256xf32>, vector<8x128xf32> -> vector<8x512xf32>
    %120 = vector.extract_strided_slice %117 {offsets = [0, 111], sizes = [8, 256], strides = [1, 1]} : vector<8x512xf32> to vector<8x256xf32>
    %121 = vector.extract_strided_slice %118 {offsets = [0, 112], sizes = [8, 256], strides = [1, 1]} : vector<8x512xf32> to vector<8x256xf32>
    %122 = vector.extract_strided_slice %119 {offsets = [0, 113], sizes = [8, 256], strides = [1, 1]} : vector<8x512xf32> to vector<8x256xf32>
    %123 = vector.extract_strided_slice %117 {offsets = [0, 127], sizes = [8, 256], strides = [1, 1]} : vector<8x512xf32> to vector<8x256xf32>
    %124 = vector.extract_strided_slice %118 {offsets = [0, 128], sizes = [8, 256], strides = [1, 1]} : vector<8x512xf32> to vector<8x256xf32>
    %125 = vector.extract_strided_slice %119 {offsets = [0, 129], sizes = [8, 256], strides = [1, 1]} : vector<8x512xf32> to vector<8x256xf32>
    %126 = vector.extract_strided_slice %117 {offsets = [0, 143], sizes = [8, 256], strides = [1, 1]} : vector<8x512xf32> to vector<8x256xf32>
    %127 = vector.extract_strided_slice %118 {offsets = [0, 144], sizes = [8, 256], strides = [1, 1]} : vector<8x512xf32> to vector<8x256xf32>
    %128 = vector.extract_strided_slice %119 {offsets = [0, 145], sizes = [8, 256], strides = [1, 1]} : vector<8x512xf32> to vector<8x256xf32>
    %129 = tpu.concatenate %120, %121, %122, %123, %124, %125, %126, %127, %128 in 0 : vector<8x256xf32>, vector<8x256xf32>, vector<8x256xf32>, vector<8x256xf32>, vector<8x256xf32>, vector<8x256xf32>, vector<8x256xf32>, vector<8x256xf32>, vector<8x256xf32> -> vector<72x256xf32>
    %cst_36 = arith.constant dense<0.000000e+00> : vector<8x256xf32>
    %130 = tpu.matmul %7, %129, %cst_36 {dimension_numbers = #tpu.dot_dimension_numbers<[1], [0], [0], [1], [0, 0, 1, 1], [], []>} : vector<8x72xf32>, vector<72x256xf32>, vector<8x256xf32> -> vector<8x256xf32>
    %cst_37 = arith.constant dense<0.000000e+00> : vector<8xf32>
    %131 = vector.multi_reduction <add>, %130, %cst_37 [1] : vector<8x256xf32> to vector<8xf32>
    %132 = vector.shape_cast %131 : vector<8xf32> to vector<8x1xf32>
    %cst_38 = arith.constant 3.906250e-03 : f32
    %133 = vector.broadcast %cst_38 : f32 to vector<8x1xf32>
    %134 = arith.mulf %132, %133 : vector<8x1xf32>
    %135 = arith.mulf %130, %130 : vector<8x256xf32>
    %cst_39 = arith.constant dense<0.000000e+00> : vector<8xf32>
    %136 = vector.multi_reduction <add>, %135, %cst_39 [1] : vector<8x256xf32> to vector<8xf32>
    %137 = vector.shape_cast %136 : vector<8xf32> to vector<8x1xf32>
    %cst_40 = arith.constant 3.906250e-03 : f32
    %138 = vector.broadcast %cst_40 : f32 to vector<8x1xf32>
    %139 = arith.mulf %137, %138 : vector<8x1xf32>
    %140 = arith.mulf %134, %134 : vector<8x1xf32>
    %141 = arith.subf %139, %140 : vector<8x1xf32>
    %cst_41 = arith.constant 0.000000e+00 : f32
    %142 = vector.broadcast %cst_41 : f32 to vector<8x1xf32>
    %143 = arith.maximumf %141, %142 : vector<8x1xf32>
    %144 = vector.broadcast %134 : vector<8x1xf32> to vector<8x256xf32>
    %145 = arith.subf %130, %144 : vector<8x256xf32>
    %cst_42 = arith.constant 9.99999974E-6 : f32
    %146 = vector.broadcast %cst_42 : f32 to vector<8x1xf32>
    %147 = arith.addf %143, %146 : vector<8x1xf32>
    %148 = math.rsqrt %147 : vector<8x1xf32>
    %149 = vector.broadcast %148 : vector<8x1xf32> to vector<8x256xf32>
    %150 = arith.mulf %145, %149 : vector<8x256xf32>
    %cst_43 = arith.constant 2.000000e-01 : f32
    %151 = vector.broadcast %cst_43 : f32 to vector<8x256xf32>
    %152 = arith.mulf %151, %150 : vector<8x256xf32>
    %153 = arith.maximumf %150, %152 : vector<8x256xf32>
    %cst_44 = arith.constant 0.000000e+00 : f32
    %154 = vector.broadcast %cst_44 : f32 to vector<8x128xf32>
    %cst_45 = arith.constant 0.000000e+00 : f32
    %155 = vector.shape_cast %4 : vector<1x256xi1> to vector<1x256xi1>
    %156 = vector.broadcast %155 : vector<1x256xi1> to vector<8x256xi1>
    %157 = vector.broadcast %cst_45 : f32 to vector<8x256xf32>
    %158 = arith.select %156, %153, %157 : vector<8x256xi1>, vector<8x256xf32>
    %cst_46 = arith.constant 0.000000e+00 : f32
    %159 = vector.shape_cast %6 : vector<1x256xi1> to vector<1x256xi1>
    %160 = vector.broadcast %159 : vector<1x256xi1> to vector<8x256xi1>
    %161 = vector.broadcast %cst_46 : f32 to vector<8x256xf32>
    %162 = arith.select %160, %153, %161 : vector<8x256xi1>, vector<8x256xf32>
    %163 = tpu.concatenate %154, %158, %154 in 1 : vector<8x128xf32>, vector<8x256xf32>, vector<8x128xf32> -> vector<8x512xf32>
    %164 = tpu.concatenate %154, %153, %154 in 1 : vector<8x128xf32>, vector<8x256xf32>, vector<8x128xf32> -> vector<8x512xf32>
    %165 = tpu.concatenate %154, %162, %154 in 1 : vector<8x128xf32>, vector<8x256xf32>, vector<8x128xf32> -> vector<8x512xf32>
    %166 = vector.extract_strided_slice %163 {offsets = [0, 111], sizes = [8, 256], strides = [1, 1]} : vector<8x512xf32> to vector<8x256xf32>
    %167 = vector.extract_strided_slice %164 {offsets = [0, 112], sizes = [8, 256], strides = [1, 1]} : vector<8x512xf32> to vector<8x256xf32>
    %168 = vector.extract_strided_slice %165 {offsets = [0, 113], sizes = [8, 256], strides = [1, 1]} : vector<8x512xf32> to vector<8x256xf32>
    %169 = vector.extract_strided_slice %163 {offsets = [0, 127], sizes = [8, 256], strides = [1, 1]} : vector<8x512xf32> to vector<8x256xf32>
    %170 = vector.extract_strided_slice %164 {offsets = [0, 128], sizes = [8, 256], strides = [1, 1]} : vector<8x512xf32> to vector<8x256xf32>
    %171 = vector.extract_strided_slice %165 {offsets = [0, 129], sizes = [8, 256], strides = [1, 1]} : vector<8x512xf32> to vector<8x256xf32>
    %172 = vector.extract_strided_slice %163 {offsets = [0, 143], sizes = [8, 256], strides = [1, 1]} : vector<8x512xf32> to vector<8x256xf32>
    %173 = vector.extract_strided_slice %164 {offsets = [0, 144], sizes = [8, 256], strides = [1, 1]} : vector<8x512xf32> to vector<8x256xf32>
    %174 = vector.extract_strided_slice %165 {offsets = [0, 145], sizes = [8, 256], strides = [1, 1]} : vector<8x512xf32> to vector<8x256xf32>
    %175 = tpu.concatenate %166, %167, %168, %169, %170, %171, %172, %173, %174 in 0 : vector<8x256xf32>, vector<8x256xf32>, vector<8x256xf32>, vector<8x256xf32>, vector<8x256xf32>, vector<8x256xf32>, vector<8x256xf32>, vector<8x256xf32>, vector<8x256xf32> -> vector<72x256xf32>
    %cst_47 = arith.constant dense<0.000000e+00> : vector<8x256xf32>
    %176 = tpu.matmul %8, %175, %cst_47 {dimension_numbers = #tpu.dot_dimension_numbers<[1], [0], [0], [1], [0, 0, 1, 1], [], []>} : vector<8x72xf32>, vector<72x256xf32>, vector<8x256xf32> -> vector<8x256xf32>
    %cst_48 = arith.constant dense<0.000000e+00> : vector<8xf32>
    %177 = vector.multi_reduction <add>, %176, %cst_48 [1] : vector<8x256xf32> to vector<8xf32>
    %178 = vector.shape_cast %177 : vector<8xf32> to vector<8x1xf32>
    %cst_49 = arith.constant 3.906250e-03 : f32
    %179 = vector.broadcast %cst_49 : f32 to vector<8x1xf32>
    %180 = arith.mulf %178, %179 : vector<8x1xf32>
    %181 = arith.mulf %176, %176 : vector<8x256xf32>
    %cst_50 = arith.constant dense<0.000000e+00> : vector<8xf32>
    %182 = vector.multi_reduction <add>, %181, %cst_50 [1] : vector<8x256xf32> to vector<8xf32>
    %183 = vector.shape_cast %182 : vector<8xf32> to vector<8x1xf32>
    %cst_51 = arith.constant 3.906250e-03 : f32
    %184 = vector.broadcast %cst_51 : f32 to vector<8x1xf32>
    %185 = arith.mulf %183, %184 : vector<8x1xf32>
    %186 = arith.mulf %180, %180 : vector<8x1xf32>
    %187 = arith.subf %185, %186 : vector<8x1xf32>
    %cst_52 = arith.constant 0.000000e+00 : f32
    %188 = vector.broadcast %cst_52 : f32 to vector<8x1xf32>
    %189 = arith.maximumf %187, %188 : vector<8x1xf32>
    %190 = vector.broadcast %180 : vector<8x1xf32> to vector<8x256xf32>
    %191 = arith.subf %176, %190 : vector<8x256xf32>
    %cst_53 = arith.constant 9.99999974E-6 : f32
    %192 = vector.broadcast %cst_53 : f32 to vector<8x1xf32>
    %193 = arith.addf %189, %192 : vector<8x1xf32>
    %194 = math.rsqrt %193 : vector<8x1xf32>
    %195 = vector.broadcast %194 : vector<8x1xf32> to vector<8x256xf32>
    %196 = arith.mulf %191, %195 : vector<8x256xf32>
    %cst_54 = arith.constant 2.000000e-01 : f32
    %197 = vector.broadcast %cst_54 : f32 to vector<8x256xf32>
    %198 = arith.mulf %197, %196 : vector<8x256xf32>
    %199 = arith.maximumf %196, %198 : vector<8x256xf32>
    %c1_55 = arith.constant 1 : index
    %c0_56 = arith.constant 0 : index
    %c0_57 = arith.constant 0 : index
    %200 = vector.load %arg4[%c1_55, %c0_56, %c0_57] : memref<2x8x256xf32, #tpu.memory_space<vmem>>, vector<1x8x256xf32>
    %201 = vector.shape_cast %200 : vector<1x8x256xf32> to vector<8x256xf32>
    %202 = vector.shape_cast %199 : vector<8x256xf32> to vector<1x8x256xf32>
    tpu.vector_store %arg4[%c1_55, %c0_56, %c0_57], %202 {strides = array<i32>} : memref<2x8x256xf32, #tpu.memory_space<vmem>>, vector<1x8x256xf32>,
    return
  }
  func.func @transform_0(%arg0: i32) -> (i32, i32, i32) {
    %c0_i32 = arith.constant 0 : i32
    %c0_i32_0 = arith.constant 0 : i32
    %c0_i32_1 = arith.constant 0 : i32
    return %arg0, %c0_i32, %c0_i32_0 : i32, i32, i32
  }
  func.func @transform_1(%arg0: i32) -> (i32, i32) {
    %c0_i32 = arith.constant 0 : i32
    %c0_i32_0 = arith.constant 0 : i32
    %c0_i32_1 = arith.constant 0 : i32
    return %c0_i32, %c0_i32_0 : i32, i32
  }
  func.func @transform_2(%arg0: i32) -> (i32, i32) {
    %c0_i32 = arith.constant 0 : i32
    %c0_i32_0 = arith.constant 0 : i32
    %c0_i32_1 = arith.constant 0 : i32
    return %c0_i32, %c0_i32_0 : i32, i32
  }
  func.func @transform_3(%arg0: i32) -> (i32, i32, i32) {
    %c0_i32 = arith.constant 0 : i32
    %c0_i32_0 = arith.constant 0 : i32
    %c0_i32_1 = arith.constant 0 : i32
    return %arg0, %c0_i32, %c0_i32_0 : i32, i32, i32
  }
}

</mosaic_0001>

<bundles_post_ra>
// kernel: convolution_block.1
= control target key start
LH: loop header
LB: loop body
LE: loop exit
PB: predicated region body
PF: predicated region fallthrough
CT: control target
= control target key end

     0   :  { %v14_v0 = vlaneseq  ;;  %v1062_v1 = vmov 0.0   ;;  %s1063_s12 = smov 94   ;;  %s1064_s15 = smov 95   ;;  %vm103_vm4 = vcmask 777216   ;;  %vm48_vm5 = vcmask 1039360   ;;  %s1589_s0 = inlined_call_operand.vmem [shape: f32[2,8,256], index: 0, kind: input, shape index: {}]   ;;  %s1590_s1 = inlined_call_operand.vmem [shape: f32[8,72], index: 1, kind: input, shape index: {}]   ;;  %s1591_s2 = inlined_call_operand.vmem [shape: f32[8,72], index: 2, kind: input, shape index: {}]   ;;  %s1592_s3 = inlined_call_operand.vmem [shape: f32[2,8,256], index: 3, kind: output, shape index: {}]  }
   0x1   :  { %110 = vrot.lane.b32.xlu1 %v1062_v1, %s1063_s12  ;;  %v26_v2 = vld [vmem:[%s1589_s0 + $0x8] sm:$0xff]  ;;  %274 = vmatprep.mubr.f32.mxu0 %v1062_v1  ;;  %v25_v3 = vld [vmem:[%s1589_s0] sm:$0xff]  ;;  %s1065_s18 = smov 96   ;;  %s1066_s19 = smov 110   ;;  %v1038_v16 = vld [vmem:[%s1589_s0 + $0x10] sm:$0xff]  ;;  %vm77_vm6 = vcmask 908288  }
   0x2   :  { %99 = vrot.lane.b32.xlu0 %v26_v2, %s1064_s15  ;;  %v15_v4 = vand.u32 127, %v14_v0  ;;  %516 = vmatprep.mubr.f32.mxu1 %v1062_v1  ;;  %s1067_s20 = smov 111   ;;  %s1068_s21 = smov 112   ;;  %v1039_v18 = vld [vmem:[%s1589_s0 + $0x18] sm:$0xff]  ;;  %vm70_vm7 = vcmask 916480   ;;  %vm59_vm8 = vcmask 1031168  }
   0x3   :  { %s1069_s22 = smov 126   ;;  %s1070_s25 = smov 127   ;;  %vm112_vm9 = vcmask 769024   ;;  %vm94_vm10 = vcmask 785408   ;;  %vm85_vm11 = vcmask 900096   ;;  %vm169_vm12 = vcmask 138240  }
   0x4   :  { %v17_v5 = vand.u32 15, %v15_v4  ;;  %v16_v6 = vadd.s32 128, %v15_v4  ;;  %s1071_s0 = smov 17   ;;  %vm206_vm13 = vcmask 588800  }
   0x5   :  { %97 = vrot.lane.b32.xlu1 %v25_v3, %s1064_s15 }
   0x6   :  { %vm1104_vm0 = vcmp.ne.s32.totalorder %v17_v5, 0  ;;  %v18_v8 = vand.u32 15, %v16_v6  ;;  %vm1127_vm3 = vcmp.ne.s32.totalorder %v17_v5, 15 }
   0x7   :  { %v37_v9 = vsel %vm1104_vm0, %v25_v3, 0.0  ;;  %v31_v15 = vsel %vm1127_vm3, %v25_v3, 0.0  ;;  %v553_v17 = vsel %vm1104_vm0, %v1038_v16, 0.0  ;;  %v1172_v20 = vsel %vm1127_vm3, %v1038_v16, 0.0 }
   0x8   :  { %106 = vrot.lane.b32.xlu0 %v37_v9, %s1063_s12  ;;  %vm1111_vm1 = vcmp.ne.s32.totalorder %v18_v8, 0  ;;  %vm1115_vm2 = vcmp.ne.s32.totalorder %v18_v8, 15 }
   0x9   :  { %101 = vrot.lane.b32.xlu1 %v1062_v1, %s1064_s15  ;;  %v38_v12 = vsel %vm1111_vm1, %v26_v2, 0.0  ;;  %v1125_v13 = vsel %vm1115_vm2, %v26_v2, 0.0  ;;  %v554_v19 = vsel %vm1111_vm1, %v1039_v18, 0.0  ;;  %v1181_v21 = vsel %vm1115_vm2, %v1039_v18, 0.0 }
   0xc   :  { %108 = vrot.lane.b32.xlu0 %v38_v12, %s1063_s12 }
   0xd   :  { %90 = vrot.lane.b32.xlu1 %v1125_v13, %s1065_s18 }
  0x10   :  { %88 = vrot.lane.b32.xlu0 %v31_v15, %s1065_s18 }
  0x11   :  { %79 = vrot.lane.b32.xlu1 %v37_v9, %s1066_s19 }
  0x14   :  { %92 = vrot.lane.b32.xlu0 %v1062_v1, %s1065_s18 }
  0x15   :  { %83 = vrot.lane.b32.xlu1 %v1062_v1, %s1066_s19 }
  0x18   :  { %81 = vrot.lane.b32.xlu0 %v38_v12, %s1066_s19 }
  0x19   :  { %75 = vrot.lane.b32.xlu1 %v26_v2, %s1067_s20 }
  0x1c   :  { %73 = vrot.lane.b32.xlu0 %v25_v3, %s1067_s20 }
  0x1d   :  { %68 = vrot.lane.b32.xlu1 %v1125_v13, %s1068_s21 }
  0x20   :  { %66 = vrot.lane.b32.xlu0 %v31_v15, %s1068_s21 }
  0x21   :  { %55 = vrot.lane.b32.xlu1 %v37_v9, %s1069_s22 }
  0x24   :  { %64 = vrot.lane.b32.xlu0 %v1062_v1, %s1068_s21 }
  0x25   :  { %53 = vrot.lane.b32.xlu1 %v1062_v1, %s1069_s22 }
  0x28   :  { %57 = vrot.lane.b32.xlu0 %v38_v12, %s1069_s22 }
  0x29   :  { %46 = vrot.lane.b32.xlu1 %v26_v2, %s1070_s25 }
  0x2c   :  { %44 = vrot.lane.b32.xlu0 %v25_v3, %s1070_s25 }
  0x2d   :  { %602 = vrot.lane.b32.xlu1 %v553_v17, %s1063_s12 }
  0x30   :  { %42 = vrot.lane.b32.xlu0 %v1062_v1, %s1070_s25 }
  0x31   :  { %596 = vrot.lane.b32.xlu1 %v1038_v16, %s1064_s15 }
  0x34   :  { %604 = vrot.lane.b32.xlu0 %v554_v19, %s1063_s12 }
  0x35   :  { %590 = vrot.lane.b32.xlu1 %v1172_v20, %s1065_s18 }
  0x38   :  { %598 = vrot.lane.b32.xlu0 %v1039_v18, %s1064_s15 }
  0x39   :  { %584 = vrot.lane.b32.xlu1 %v553_v17, %s1066_s19 }
  0x3c   :  { %592 = vrot.lane.b32.xlu0 %v1181_v21, %s1065_s18 }
  0x3d   :  { %579 = vrot.lane.b32.xlu1 %v1038_v16, %s1067_s20 }
  0x40   :  { %586 = vrot.lane.b32.xlu0 %v554_v19, %s1066_s19 }
  0x41   :  { %573 = vrot.lane.b32.xlu1 %v1172_v20, %s1068_s21 }
  0x44   :  { %581 = vrot.lane.b32.xlu0 %v1039_v18, %s1067_s20 }
  0x45   :  { %565 = vrot.lane.b32.xlu1 %v553_v17, %s1069_s22 }
  0x48   :  { %575 = vrot.lane.b32.xlu0 %v1181_v21, %s1068_s21 }
  0x49   :  { %557 = vrot.lane.b32.xlu1 %v1038_v16, %s1070_s25 }
  0x4c   :  { %567 = vrot.lane.b32.xlu0 %v554_v19, %s1069_s22 }
  0x4d   :  { %117 = vrot.lane.b32.xlu1 %v31_v15, %s1071_s0 }
  0x50   :  { %559 = vrot.lane.b32.xlu0 %v1039_v18, %s1070_s25 }
  0x73   :  { %v1197_v22 = vpop.permute.xlu1 %110 }
  0x74   :  { %v100_v23 = vpop.permute.xlu0 %99 }
  0x77   :  { %v98_v24 = vpop.permute.xlu1 %97 }
  0x78   :  { %157 = vrot.lane.b32.xlu0 %v98_v24, %s1071_s0  ;;  %v104_v37 = vsel %vm103_vm4, %v98_v24, %v100_v23 }
  0x7a   :  { %v107_v25 = vpop.permute.xlu0 %106 }
  0x7b   :  { %v1200_v26 = vpop.permute.xlu1 %101 }
  0x7c   :  { %v105_v45 = vsel %vm103_vm4, %v100_v23, %v1200_v26 }
  0x7e   :  { %v109_v27 = vpop.permute.xlu0 %108 }
  0x7f   :  { %v91_v28 = vpop.permute.xlu1 %90  ;;  %v114_v52 = vsel %vm112_vm9, %v109_v27, %v1197_v22  ;;  %v113_v53 = vsel %vm112_vm9, %v107_v25, %v109_v27 }
  0x82   :  { %v89_v29 = vpop.permute.xlu0 %88 }
  0x83   :  { %v80_v30 = vpop.permute.xlu1 %79  ;;  %v95_v55 = vsel %vm94_vm10, %v89_v29, %v91_v28 }
  0x86   :  { %v1202_v31 = vpop.permute.xlu0 %92 }
  0x87   :  { %v1204_v32 = vpop.permute.xlu1 %83  ;;  %v96_v54 = vsel %vm94_vm10, %v91_v28, %v1202_v31 }
  0x8a   :  { %v82_v33 = vpop.permute.xlu0 %81 }
  0x8b   :  { %v76_v34 = vpop.permute.xlu1 %75  ;;  %v86_v56 = vsel %vm85_vm11, %v80_v30, %v82_v33  ;;  %v87_v57 = vsel %vm85_vm11, %v82_v33, %v1204_v32 }
  0x8c   :  { %143 = vrot.lane.b32.xlu0 %v76_v34, %s1071_s0 }
  0x8e   :  { %v74_v35 = vpop.permute.xlu0 %73 }
  0x8f   :  { %v69_v36 = vpop.permute.xlu1 %68  ;;  %139 = vrot.lane.b32.xlu1 %v74_v35, %s1071_s0  ;;  %v78_v48 = vsel %vm77_vm6, %v74_v35, %v76_v34 }
  0x90   :  { %159 = vrot.lane.b32.xlu0 %v104_v37, %s1071_s0 }
  0x92   :  { %v67_v38 = vpop.permute.xlu0 %66 }
  0x93   :  { %v56_v39 = vpop.permute.xlu1 %55  ;;  %v72_v58 = vsel %vm70_vm7, %v67_v38, %v69_v36 }
  0x96   :  { %v1210_v40 = vpop.permute.xlu0 %64 }
  0x97   :  { %v1212_v41 = vpop.permute.xlu1 %53  ;;  %v71_v50 = vsel %vm70_vm7, %v1210_v40, %v67_v38 }
  0x98   :  { %v60_v51 = vsel %vm59_vm8, %v1212_v41, %v56_v39 }
  0x9a   :  { %v58_v42 = vpop.permute.xlu0 %57 }
  0x9b   :  { %v47_v43 = vpop.permute.xlu1 %46  ;;  %v61_v59 = vsel %vm59_vm8, %v56_v39, %v58_v42 }
  0x9c   :  { %125 = vrot.lane.b32.xlu1 %v47_v43, %s1071_s0 }
  0x9e   :  { %v45_v44 = vpop.permute.xlu0 %44 }
  0x9f   :  { %v50_v46 = vsel %vm48_vm5, %v45_v44, %v47_v43  ;;  %v603_v60 = vpop.permute.xlu1 %602 }
  0xa0   :  { %161 = vrot.lane.b32.xlu1 %v105_v45, %s1071_s0  ;;  %123 = vrot.lane.b32.xlu0 %v50_v46, %s1071_s0 }
  0xa2   :  { %v1220_v47 = vpop.permute.xlu0 %42 }
  0xa3   :  { %v49_v49 = vsel %vm48_vm5, %v1220_v47, %v45_v44  ;;  %v597_v63 = vpop.permute.xlu1 %596 }
  0xa4   :  { %141 = vrot.lane.b32.xlu1 %v78_v48, %s1071_s0  ;;  %121 = vrot.lane.b32.xlu0 %v49_v49, %s1071_s0 }
  0xa6   :  { %v605_v61 = vpop.permute.xlu0 %604 }
  0xa7   :  { %v606_v62 = vsel %vm112_vm9, %v603_v60, %v605_v61  ;;  %v607_v2 = vsel %vm112_vm9, %v605_v61, %v1197_v22  ;;  %v591_v5 = vpop.permute.xlu1 %590 }
  0xa8   :  { %163 = vrot.lane.b32.xlu1 %v107_v25, %s1071_s0  ;;  %145 = vrot.lane.b32.xlu0 %v80_v30, %s1071_s0 }
  0xaa   :  { %v599_v0 = vpop.permute.xlu0 %598 }
  0xab   :  { %v600_v3 = vsel %vm103_vm4, %v597_v63, %v599_v0  ;;  %v601_v4 = vsel %vm103_vm4, %v599_v0, %v1200_v26  ;;  %v585_v9 = vpop.permute.xlu1 %584 }
  0xac   :  { %151 = vrot.lane.b32.xlu1 %v89_v29, %s1071_s0  ;;  %133 = vrot.lane.b32.xlu0 %v71_v50, %s1071_s0 }
  0xae   :  { %v593_v6 = vpop.permute.xlu0 %592 }
  0xaf   :  { %v594_v8 = vsel %vm94_vm10, %v591_v5, %v593_v6  ;;  %v595_v12 = vsel %vm94_vm10, %v593_v6, %v1202_v31  ;;  %v580_v17 = vpop.permute.xlu1 %579 }
  0xb0   :  { %127 = vrot.lane.b32.xlu1 %v60_v51, %s1071_s0  ;;  %131 = vrot.lane.b32.xlu0 %v58_v42, %s1071_s0 }
  0xb3   :  { %v574_v23 = vpop.permute.xlu1 %573 }
  0xb4   :  { %137 = vrot.lane.b32.xlu1 %v69_v36, %s1071_s0  ;;  %167 = vrot.lane.b32.xlu0 %v114_v52, %s1071_s0  ;;  %v577_v30 = vsel %vm70_vm7, %v1210_v40, %v574_v23 }
  0xb7   :  { %v566_v27 = vpop.permute.xlu1 %565 }
  0xb8   :  { %165 = vrot.lane.b32.xlu1 %v113_v53, %s1071_s0  ;;  %155 = vrot.lane.b32.xlu0 %v96_v54, %s1071_s0  ;;  %v569_v33 = vsel %vm59_vm8, %v1212_v41, %v566_v27 }
  0xbb   :  { %v558_v34 = vpop.permute.xlu1 %557 }
  0xbc   :  { %153 = vrot.lane.b32.xlu1 %v95_v55, %s1071_s0  ;;  %147 = vrot.lane.b32.xlu0 %v86_v56, %s1071_s0  ;;  %v561_v37 = vsel %vm48_vm5, %v1220_v47, %v558_v34 }
  0xbf   :  { %v1311_v39 = vpop.permute.xlu1 %117 }
  0xc0   :  { %149 = vrot.lane.b32.xlu1 %v87_v57, %s1071_s0  ;;  %135 = vrot.lane.b32.xlu0 %v72_v58, %s1071_s0 }
  0xc4   :  { %129 = vrot.lane.b32.xlu1 %v61_v59, %s1071_s0  ;;  %119 = vrot.lane.b32.xlu0 %v1125_v13, %s1071_s0  ;;  %v587_v13 = vpop.permute.xlu0 %586 }
  0xc5   :  { %v588_v15 = vsel %vm85_vm11, %v585_v9, %v587_v13  ;;  %v589_v16 = vsel %vm85_vm11, %v587_v13, %v1204_v32 }
  0xc8   :  { %115 = vrot.lane.b32.xlu1 %v1062_v1, %s1071_s0  ;;  %656 = vrot.lane.b32.xlu0 %v606_v62, %s1071_s0  ;;  %v582_v18 = vpop.permute.xlu0 %581 }
  0xc9   :  { %v583_v19 = vsel %vm77_vm6, %v580_v17, %v582_v18 }
  0xcc   :  { %658 = vrot.lane.b32.xlu1 %v607_v2, %s1071_s0  ;;  %654 = vrot.lane.b32.xlu0 %v603_v60, %s1071_s0  ;;  %v576_v24 = vpop.permute.xlu0 %575 }
  0xcd   :  { %v578_v25 = vsel %vm70_vm7, %v574_v23, %v576_v24 }
  0xd0   :  { %652 = vrot.lane.b32.xlu0 %v601_v4, %s1071_s0  ;;  %650 = vrot.lane.b32.xlu1 %v600_v3, %s1071_s0  ;;  %v568_v28 = vpop.permute.xlu0 %567 }
  0xd1   :  { %v570_v29 = vsel %vm59_vm8, %v566_v27, %v568_v28 }
  0xd4   :  { %648 = vrot.lane.b32.xlu1 %v597_v63, %s1071_s0  ;;  %644 = vrot.lane.b32.xlu0 %v594_v8, %s1071_s0  ;;  %v560_v35 = vpop.permute.xlu0 %559 }
  0xd5   :  { %v562_v36 = vsel %vm48_vm5, %v558_v34, %v560_v35 }
  0xd8   :  { %646 = vrot.lane.b32.xlu1 %v595_v12, %s1071_s0  ;;  %642 = vrot.lane.b32.xlu0 %v591_v5, %s1071_s0 }
  0xdc   :  { %640 = vrot.lane.b32.xlu0 %v589_v16, %s1071_s0  ;;  %638 = vrot.lane.b32.xlu1 %v588_v15, %s1071_s0 }
  0xe0   :  { %636 = vrot.lane.b32.xlu1 %v585_v9, %s1071_s0  ;;  %632 = vrot.lane.b32.xlu0 %v583_v19, %s1071_s0 }
  0xe4   :  { %630 = vrot.lane.b32.xlu0 %v580_v17, %s1071_s0  ;;  %634 = vrot.lane.b32.xlu1 %v582_v18, %s1071_s0 }
  0xe8   :  { %626 = vrot.lane.b32.xlu1 %v578_v25, %s1071_s0  ;;  %628 = vrot.lane.b32.xlu0 %v576_v24, %s1071_s0 }
  0xea   :  { %v158_v38 = vpop.permute.xlu0 %157 }
  0xec   :  { %624 = vrot.lane.b32.xlu1 %v577_v30, %s1071_s0  ;;  %620 = vrot.lane.b32.xlu0 %v570_v29, %s1071_s0  ;;  %v1336_v29 = vld [vmem:[%s1590_s1] sm:$0xff] }
  0xf0   :  { %618 = vrot.lane.b32.xlu0 %v569_v33, %s1071_s0  ;;  %622 = vrot.lane.b32.xlu1 %v568_v28, %s1071_s0 }
  0xf4   :  { %614 = vrot.lane.b32.xlu1 %v562_v36, %s1071_s0  ;;  %616 = vrot.lane.b32.xlu0 %v560_v35, %s1071_s0 }
  0xf8   :  { %612 = vrot.lane.b32.xlu1 %v561_v37, %s1071_s0  ;;  %608 = vrot.lane.b32.xlu0 %v1172_v20, %s1071_s0 }
  0xfc   :  { %610 = vrot.lane.b32.xlu1 %v1181_v21, %s1071_s0 }
  0xfe   :  { %v144_v42 = vpop.permute.xlu0 %143 }
 0x101   :  { %v140_v43 = vpop.permute.xlu1 %139 }
 0x102   :  { %v160_v44 = vpop.permute.xlu0 %159 }
 0x103   :  { %v184_v0 = vsel %vm169_vm12, %v158_v38, %v160_v44 }
 0x10e   :  { %v126_v45 = vpop.permute.xlu1 %125 }
 0x112   :  { %v162_v46 = vpop.permute.xlu1 %161  ;;  %v124_v48 = vpop.permute.xlu0 %123 }
 0x113   :  { %v185_v61 = vsel %vm169_vm12, %v160_v44, %v162_v46  ;;  %v173_v25 = vsel %vm169_vm12, %v124_v48, %v126_v45 }
 0x116   :  { %v142_v49 = vpop.permute.xlu1 %141  ;;  %v122_v50 = vpop.permute.xlu0 %121 }
 0x117   :  { %v179_v9 = vsel %vm169_vm12, %v142_v49, %v144_v42  ;;  %v178_v15 = vsel %vm169_vm12, %v140_v43, %v142_v49  ;;  %v172_v27 = vsel %vm169_vm12, %v122_v50, %v124_v48 }
 0x11a   :  { %v164_v51 = vpop.permute.xlu1 %163  ;;  %v146_v52 = vpop.permute.xlu0 %145 }
 0x11e   :  { %v152_v53 = vpop.permute.xlu1 %151  ;;  %v134_v54 = vpop.permute.xlu0 %133 }
 0x122   :  { %v128_v55 = vpop.permute.xlu1 %127  ;;  %v132_v20 = vpop.permute.xlu0 %131 }
 0x126   :  { %v138_v56 = vpop.permute.xlu1 %137  ;;  %v168_v57 = vpop.permute.xlu0 %167 }
 0x12a   :  { %v166_v21 = vpop.permute.xlu1 %165  ;;  %v156_v58 = vpop.permute.xlu0 %155 }
 0x12b   :  { %v187_v59 = vsel %vm169_vm12, %v166_v21, %v168_v57  ;;  %v186_v60 = vsel %vm169_vm12, %v164_v51, %v166_v21 }
 0x12c   :  { %224 = vmatprep.subr.mxu0 %v187_v59 }
 0x12d   :  { %225 = vmatpush1.msra.mxu0 %v186_v60 }
 0x12e   :  { %v154_v62 = vpop.permute.xlu1 %153  ;;  %226 = vmatprep.subr.mxu0 %v185_v61  ;;  %v148_v63 = vpop.permute.xlu0 %147 }
 0x12f   :  { %227 = vmatpush1.msra.mxu0 %v184_v0  ;;  %v183_v2 = vsel %vm169_vm12, %v154_v62, %v156_v58  ;;  %v182_v3 = vsel %vm169_vm12, %v152_v53, %v154_v62  ;;  %v180_v8 = vsel %vm169_vm12, %v146_v52, %v148_v63 }
 0x130   :  { %228 = vmatprep.subr.mxu0 %v183_v2 }
 0x131   :  { %229 = vmatpush1.msra.mxu0 %v182_v3 }
 0x132   :  { %v150_v4 = vpop.permute.xlu1 %149  ;;  %v136_v5 = vpop.permute.xlu0 %135 }
 0x133   :  { %v181_v6 = vsel %vm169_vm12, %v148_v63, %v150_v4  ;;  %v177_v16 = vsel %vm169_vm12, %v136_v5, %v138_v56  ;;  %v176_v17 = vsel %vm169_vm12, %v134_v54, %v136_v5 }
 0x134   :  { %230 = vmatprep.subr.mxu0 %v181_v6 }
 0x135   :  { %231 = vmatpush1.msra.mxu0 %v180_v8 }
 0x136   :  { %v130_v12 = vpop.permute.xlu1 %129  ;;  %232 = vmatprep.subr.mxu0 %v179_v9  ;;  %v120_v13 = vpop.permute.xlu0 %119 }
 0x137   :  { %233 = vmatpush1.msra.mxu0 %v178_v15  ;;  %v175_v18 = vsel %vm169_vm12, %v130_v12, %v132_v20  ;;  %v174_v24 = vsel %vm169_vm12, %v128_v55, %v130_v12  ;;  %v171_v28 = vsel %vm169_vm12, %v1311_v39, %v120_v13 }
 0x138   :  { %234 = vmatprep.subr.mxu0 %v177_v16 }
 0x139   :  { %235 = vmatpush1.msra.mxu0 %v176_v17 }
 0x13a   :  { %v1326_v19 = vpop.permute.xlu1 %115  ;;  %236 = vmatprep.subr.mxu0 %v175_v18  ;;  %v657_v23 = vpop.permute.xlu0 %656 }
 0x13b   :  { %237 = vmatpush1.msra.mxu0 %v174_v24  ;;  %v170_v34 = vsel %vm169_vm12, %v1326_v19, %v1311_v39 }
 0x13c   :  { %238 = vmatprep.subr.mxu0 %v173_v25 }
 0x13d   :  { %239 = vmatpush1.msra.mxu0 %v172_v27 }
 0x13e   :  { %v659_v30 = vpop.permute.xlu1 %658  ;;  %240 = vmatprep.subr.mxu0 %v171_v28  ;;  %v655_v33 = vpop.permute.xlu0 %654 }
 0x13f   :  { %v676_v35 = vsel %vm169_vm12, %v655_v33, %v657_v23  ;;  %241 = vmatpush1.msra.mxu0 %v170_v34  ;;  %v677_v36 = vsel %vm169_vm12, %v657_v23, %v659_v30 }
 0x140   :  { %1036 = vmatmul.mubr.msk.f32.vlgmr.msra.gmra.mxu0 %vm206_vm13, %v1336_v29  ;;  %710 = vmatprep.subr.mxu0 %v677_v36 }
 0x141   :  { %711 = vmatpush1.msra.mxu0 %v676_v35  ;;  %760 = vmatprep.mubr.f32.mxu0 %v1062_v1 }
 0x142   :  { %v651_v37 = vpop.permute.xlu1 %650  ;;  %v653_v38 = vpop.permute.xlu0 %652 }
 0x143   :  { %v675_v42 = vsel %vm169_vm12, %v651_v37, %v653_v38 }
 0x144   :  { %712 = vmatprep.subr.mxu0 %v675_v42 }
 0x146   :  { %v649_v43 = vpop.permute.xlu1 %648  ;;  %v645_v44 = vpop.permute.xlu0 %644 }
 0x147   :  { %v674_v39 = vsel %vm169_vm12, %v649_v43, %v651_v37 }
 0x148   :  { %713 = vmatpush1.msra.mxu0 %v674_v39 }
 0x14a   :  { %v647_v45 = vpop.permute.xlu1 %646  ;;  %v643_v46 = vpop.permute.xlu0 %642 }
 0x14b   :  { %v672_v48 = vsel %vm169_vm12, %v643_v46, %v645_v44  ;;  %v673_v49 = vsel %vm169_vm12, %v645_v44, %v647_v45 }
 0x14c   :  { %714 = vmatprep.subr.mxu0 %v673_v49 }
 0x14d   :  { %715 = vmatpush1.msra.mxu0 %v672_v48 }
 0x14e   :  { %v639_v50 = vpop.permute.xlu1 %638  ;;  %v641_v51 = vpop.permute.xlu0 %640 }
 0x14f   :  { %v671_v52 = vsel %vm169_vm12, %v639_v50, %v641_v51 }
 0x150   :  { %716 = vmatprep.subr.mxu0 %v671_v52 }
 0x152   :  { %v637_v53 = vpop.permute.xlu1 %636  ;;  %v633_v54 = vpop.permute.xlu0 %632 }
 0x153   :  { %v670_v55 = vsel %vm169_vm12, %v637_v53, %v639_v50 }
 0x154   :  { %717 = vmatpush1.msra.mxu0 %v670_v55 }
 0x156   :  { %v635_v20 = vpop.permute.xlu1 %634  ;;  %v631_v56 = vpop.permute.xlu0 %630 }
 0x157   :  { %v668_v57 = vsel %vm169_vm12, %v631_v56, %v633_v54  ;;  %v669_v21 = vsel %vm169_vm12, %v633_v54, %v635_v20 }
 0x158   :  { %718 = vmatprep.subr.mxu0 %v669_v21 }
 0x159   :  { %719 = vmatpush1.msra.mxu0 %v668_v57 }
 0x15a   :  { %v627_v58 = vpop.permute.xlu1 %626  ;;  %v629_v59 = vpop.permute.xlu0 %628 }
 0x15b   :  { %v667_v60 = vsel %vm169_vm12, %v627_v58, %v629_v59 }
 0x15c   :  { %720 = vmatprep.subr.mxu0 %v667_v60 }
 0x15e   :  { %v625_v61 = vpop.permute.xlu1 %624  ;;  %v621_v62 = vpop.permute.xlu0 %620 }
 0x15f   :  { %v666_v63 = vsel %vm169_vm12, %v625_v61, %v627_v58 }
 0x160   :  { %721 = vmatpush1.msra.mxu0 %v666_v63 }
 0x162   :  { %v623_v0 = vpop.permute.xlu1 %622  ;;  %v619_v2 = vpop.permute.xlu0 %618 }
 0x163   :  { %v664_v3 = vsel %vm169_vm12, %v619_v2, %v621_v62  ;;  %v665_v4 = vsel %vm169_vm12, %v621_v62, %v623_v0 }
 0x164   :  { %722 = vmatprep.subr.mxu0 %v665_v4 }
 0x165   :  { %723 = vmatpush1.msra.mxu0 %v664_v3 }
 0x166   :  { %v615_v5 = vpop.permute.xlu1 %614  ;;  %v617_v6 = vpop.permute.xlu0 %616 }
 0x167   :  { %v663_v8 = vsel %vm169_vm12, %v615_v5, %v617_v6 }
 0x168   :  { %724 = vmatprep.subr.mxu0 %v663_v8 }
 0x16a   :  { %v613_v9 = vpop.permute.xlu1 %612  ;;  %v609_v13 = vpop.permute.xlu0 %608 }
 0x16b   :  { %v662_v12 = vsel %vm169_vm12, %v613_v9, %v615_v5  ;;  %v660_v17 = vsel %vm169_vm12, %v1326_v19, %v609_v13 }
 0x16c   :  { %725 = vmatpush1.msra.mxu0 %v662_v12 }
 0x16e   :  { %v611_v15 = vpop.permute.xlu1 %610 }
 0x16f   :  { %v661_v16 = vsel %vm169_vm12, %v609_v13, %v611_v15 }
 0x170   :  { %726 = vmatprep.subr.mxu0 %v661_v16 }
 0x171   :  { %727 = vmatpush1.msra.mxu0 %v660_v17 }
 0x172   :  { %1040 = vmatmul.mubr.msk.f32.vlgmr.msra.gmra.mxu0 %vm206_vm13, %v1336_v29 }
 0x200   :  { %v276_v18 = vpop.f32.mrf.mxu0 }
 0x201   :  { %v285_v25 = vmul.f32 %v276_v18, %v276_v18 }
 0x202   :  { %v278_v23 = vpop.f32.mrf.mxu0 }
 0x203   :  { %v281_v24 = vadd.f32 %v278_v23, %v276_v18  ;;  %v286_v27 = vmul.f32 %v278_v23, %v278_v23 }
 0x205   :  { %282 = vadd.xlane.f32.xlu0 %v281_v24  ;;  %v287_v28 = vadd.f32 %v286_v27, %v285_v25 }
 0x207   :  { %288 = vadd.xlane.f32.xlu1 %v287_v28 }
 0x232   :  { %v762_v30 = vpop.f32.mrf.mxu0 }
 0x233   :  { %v771_v36 = vmul.f32 %v762_v30, %v762_v30 }
 0x234   :  { %v764_v33 = vpop.f32.mrf.mxu0 }
 0x235   :  { %v772_v34 = vmul.f32 %v764_v33, %v764_v33  ;;  %v767_v35 = vadd.f32 %v764_v33, %v762_v30 }
 0x237   :  { %768 = vadd.xlane.f32.xlu0 %v767_v35  ;;  %v773_v37 = vadd.f32 %v772_v34, %v771_v36 }
 0x23b   :  { %774 = vadd.xlane.f32.xlu0 %v773_v37 }
 0x28e   :  { %v283_v38 = vpop.xlane.xlu0 %282 }
 0x28f   :  { %v284_v42 = vmul.f32 0.00390625, %v283_v38 }
 0x290   :  { %v289_v43 = vpop.xlane.xlu1 %288 }
 0x291   :  { %v290_v29 = vmul.f32 0.00390625, %v289_v43  ;;  %v291_v44 = vmul.f32 %v284_v42, %v284_v42  ;;  %v294_v48 = vsub.f32 %v276_v18, %v284_v42  ;;  %v295_v49 = vsub.f32 %v278_v23, %v284_v42 }
 0x293   :  { %v292_v39 = vsub.f32 %v290_v29, %v291_v44 }
 0x295   :  { %v293_v45 = vmax.f32 %v292_v39, 0.0 }
 0x297   :  { %v296_v46 = vadd.f32 1e-05, %v293_v45 }
 0x299   :  { %1054 = vrsqrt.f32 %v296_v46 }
 0x2a6   :  { %v1055_v50 = vpop.eup %1054 }
 0x2a7   :  { %v298_v51 = vmul.f32 %v1055_v50, %v294_v48  ;;  %v299_v52 = vmul.f32 %v1055_v50, %v295_v49 }
 0x2a9   :  { %v300_v53 = vmul.f32 0.2, %v298_v51  ;;  %v301_v55 = vmul.f32 0.2, %v299_v52 }
 0x2ab   :  { %v302_v54 = vmax.f32 %v298_v51, %v300_v53  ;;  %v303_v20 = vmax.f32 %v299_v52, %v301_v55 }
 0x2ad   :  { %332 = vrot.lane.b32.xlu0 %v302_v54, %s1067_s20  ;;  %349 = vrot.lane.b32.xlu1 %v302_v54, %s1064_s15  ;;  %v307_v56 = vsel %vm1111_vm1, %v303_v20, 0.0  ;;  %v304_v57 = vsel %vm1127_vm3, %v302_v54, 0.0  ;;  %v306_v21 = vsel %vm1104_vm0, %v302_v54, 0.0  ;;  %v305_v59 = vsel %vm1115_vm2, %v303_v20, 0.0 }
 0x2b1   :  { %310 = vrot.lane.b32.xlu0 %v302_v54, %s1070_s25  ;;  %351 = vrot.lane.b32.xlu1 %v303_v20, %s1064_s15 }
 0x2b5   :  { %357 = vrot.lane.b32.xlu0 %v307_v56, %s1063_s12  ;;  %334 = vrot.lane.b32.xlu1 %v303_v20, %s1067_s20 }
 0x2b9   :  { %312 = vrot.lane.b32.xlu1 %v303_v20, %s1070_s25  ;;  %343 = vrot.lane.b32.xlu0 %v304_v57, %s1065_s18 }
 0x2bd   :  { %355 = vrot.lane.b32.xlu1 %v306_v21, %s1063_s12  ;;  %337 = vrot.lane.b32.xlu0 %v306_v21, %s1066_s19 }
 0x2c0   :  { %v769_v58 = vpop.xlane.xlu0 %768 }
 0x2c1   :  { %v770_v60 = vmul.f32 0.00390625, %v769_v58  ;;  %345 = vrot.lane.b32.xlu1 %v305_v59, %s1065_s18  ;;  %326 = vrot.lane.b32.xlu0 %v304_v57, %s1068_s21 }
 0x2c3   :  { %v777_v62 = vmul.f32 %v770_v60, %v770_v60  ;;  %v780_v4 = vsub.f32 %v762_v30, %v770_v60  ;;  %v781_v5 = vsub.f32 %v764_v33, %v770_v60 }
 0x2c4   :  { %v775_v61 = vpop.xlane.xlu0 %774 }
 0x2c5   :  { %v776_v63 = vmul.f32 0.00390625, %v775_v61  ;;  %339 = vrot.lane.b32.xlu1 %v307_v56, %s1066_s19  ;;  %318 = vrot.lane.b32.xlu0 %v306_v21, %s1069_s22 }
 0x2c7   :  { %v778_v0 = vsub.f32 %v776_v63, %v777_v62 }
 0x2c9   :  { %v779_v2 = vmax.f32 %v778_v0, 0.0  ;;  %328 = vrot.lane.b32.xlu1 %v305_v59, %s1068_s21  ;;  %361 = vrot.lane.b32.xlu0 %v304_v57, %s1071_s0 }
 0x2cb   :  { %v782_v3 = vadd.f32 1e-05, %v779_v2 }
 0x2cd   :  { %1056 = vrsqrt.f32 %v782_v3  ;;  %320 = vrot.lane.b32.xlu1 %v307_v56, %s1069_s22 }
 0x2d1   :  { %363 = vrot.lane.b32.xlu1 %v305_v59, %s1071_s0 }
 0x2da   :  { %v1057_v6 = vpop.eup %1056 }
 0x2db   :  { %v785_v8 = vmul.f32 %v1057_v6, %v781_v5  ;;  %v784_v9 = vmul.f32 %v1057_v6, %v780_v4 }
 0x2dd   :  { %v787_v12 = vmul.f32 0.2, %v785_v8  ;;  %v786_v13 = vmul.f32 0.2, %v784_v9 }
 0x2df   :  { %v789_v15 = vmax.f32 %v785_v8, %v787_v12  ;;  %v788_v16 = vmax.f32 %v784_v9, %v786_v13 }
 0x2e1   :  { %837 = vrot.lane.b32.xlu1 %v789_v15, %s1064_s15  ;;  %835 = vrot.lane.b32.xlu0 %v788_v16, %s1064_s15  ;;  %v793_v17 = vsel %vm1111_vm1, %v789_v15, 0.0  ;;  %v792_v18 = vsel %vm1104_vm0, %v788_v16, 0.0  ;;  %v1405_v23 = vsel %vm1115_vm2, %v789_v15, 0.0  ;;  %v1409_v24 = vsel %vm1127_vm3, %v788_v16, 0.0 }
 0x2e5   :  { %820 = vrot.lane.b32.xlu1 %v789_v15, %s1067_s20  ;;  %818 = vrot.lane.b32.xlu0 %v788_v16, %s1067_s20 }
 0x2e9   :  { %798 = vrot.lane.b32.xlu1 %v789_v15, %s1070_s25  ;;  %796 = vrot.lane.b32.xlu0 %v788_v16, %s1070_s25 }
 0x2ed   :  { %843 = vrot.lane.b32.xlu1 %v793_v17, %s1063_s12  ;;  %841 = vrot.lane.b32.xlu0 %v792_v18, %s1063_s12 }
 0x2f1   :  { %831 = vrot.lane.b32.xlu1 %v1405_v23, %s1065_s18  ;;  %829 = vrot.lane.b32.xlu0 %v1409_v24, %s1065_s18 }
 0x2f5   :  { %825 = vrot.lane.b32.xlu1 %v793_v17, %s1066_s19  ;;  %823 = vrot.lane.b32.xlu0 %v792_v18, %s1066_s19 }
 0x2f9   :  { %814 = vrot.lane.b32.xlu1 %v1405_v23, %s1068_s21  ;;  %812 = vrot.lane.b32.xlu0 %v1409_v24, %s1068_s21 }
 0x2fd   :  { %806 = vrot.lane.b32.xlu1 %v793_v17, %s1069_s22  ;;  %804 = vrot.lane.b32.xlu0 %v792_v18, %s1069_s22 }
 0x31f   :  { %v350_v7 = vpop.permute.xlu1 %349  ;;  %v333_v10 = vpop.permute.xlu0 %332 }
 0x320   :  { %401 = vrot.lane.b32.xlu1 %v350_v7, %s1071_s0  ;;  %383 = vrot.lane.b32.xlu0 %v333_v10, %s1071_s0 }
 0x323   :  { %v352_v11 = vpop.permute.xlu1 %351  ;;  %v311_v14 = vpop.permute.xlu0 %310 }
 0x324   :  { %v353_v28 = vsel %vm103_vm4, %v350_v7, %v352_v11  ;;  %v354_v36 = vsel %vm103_vm4, %v352_v11, %v1200_v26  ;;  %v314_v51 = vsel %vm48_vm5, %v1220_v47, %v311_v14 }
 0x327   :  { %v335_v25 = vpop.permute.xlu1 %334  ;;  %v358_v27 = vpop.permute.xlu0 %357 }
 0x328   :  { %387 = vrot.lane.b32.xlu1 %v335_v25, %s1071_s0  ;;  %v336_v43 = vsel %vm77_vm6, %v333_v10, %v335_v25  ;;  %v360_v53 = vsel %vm112_vm9, %v358_v27, %v1197_v22 }
 0x32b   :  { %v313_v30 = vpop.permute.xlu1 %312  ;;  %v344_v33 = vpop.permute.xlu0 %343 }
 0x32c   :  { %403 = vrot.lane.b32.xlu1 %v353_v28, %s1071_s0  ;;  %369 = vrot.lane.b32.xlu0 %v313_v30, %s1071_s0  ;;  %v315_v45 = vsel %vm48_vm5, %v311_v14, %v313_v30 }
 0x32f   :  { %v356_v34 = vpop.permute.xlu1 %355  ;;  %v338_v35 = vpop.permute.xlu0 %337 }
 0x330   :  { %407 = vrot.lane.b32.xlu0 %v356_v34, %s1071_s0  ;;  %389 = vrot.lane.b32.xlu1 %v338_v35, %s1071_s0  ;;  %v359_v46 = vsel %vm112_vm9, %v356_v34, %v358_v27 }
 0x333   :  { %v346_v37 = vpop.permute.xlu1 %345  ;;  %v327_v38 = vpop.permute.xlu0 %326 }
 0x334   :  { %405 = vrot.lane.b32.xlu0 %v354_v36, %s1071_s0  ;;  %v347_v52 = vsel %vm94_vm10, %v344_v33, %v346_v37  ;;  %v348_v55 = vsel %vm94_vm10, %v346_v37, %v1202_v31  ;;  %v330_v62 = vsel %vm70_vm7, %v1210_v40, %v327_v38 }
 0x337   :  { %v340_v42 = vpop.permute.xlu1 %339  ;;  %v319_v44 = vpop.permute.xlu0 %318 }
 0x338   :  { %395 = vrot.lane.b32.xlu0 %v344_v33, %s1071_s0  ;;  %v342_v54 = vsel %vm85_vm11, %v340_v42, %v1204_v32  ;;  %v341_v56 = vsel %vm85_vm11, %v338_v35, %v340_v42  ;;  %v322_v57 = vsel %vm59_vm8, %v1212_v41, %v319_v44 }
 0x33b   :  { %v329_v29 = vpop.permute.xlu1 %328  ;;  %v1441_v48 = vpop.permute.xlu0 %361 }
 0x33c   :  { %385 = vrot.lane.b32.xlu0 %v336_v43, %s1071_s0  ;;  %v331_v59 = vsel %vm70_vm7, %v327_v38, %v329_v29 }
 0x33f   :  { %v321_v39 = vpop.permute.xlu1 %320 }
 0x340   :  { %381 = vrot.lane.b32.xlu0 %v329_v29, %s1071_s0  ;;  %375 = vrot.lane.b32.xlu1 %v321_v39, %s1071_s0  ;;  %v323_v20 = vsel %vm59_vm8, %v319_v44, %v321_v39 }
 0x343   :  { %v364_v49 = vpop.permute.xlu1 %363 }
 0x344   :  { %409 = vrot.lane.b32.xlu0 %v359_v46, %s1071_s0  ;;  %367 = vrot.lane.b32.xlu1 %v315_v45, %s1071_s0  ;;  %v1447_v50 = vsel %vm169_vm12, %v1441_v48, %v364_v49 }
 0x348   :  { %397 = vrot.lane.b32.xlu0 %v347_v52, %s1071_s0  ;;  %365 = vrot.lane.b32.xlu1 %v314_v51, %s1071_s0 }
 0x34c   :  { %393 = vrot.lane.b32.xlu0 %v342_v54, %s1071_s0  ;;  %411 = vrot.lane.b32.xlu1 %v360_v53, %s1071_s0 }
 0x350   :  { %399 = vrot.lane.b32.xlu1 %v348_v55, %s1071_s0  ;;  %373 = vrot.lane.b32.xlu0 %v323_v20, %s1071_s0 }
 0x353   :  { %v838_v21 = vpop.permute.xlu1 %837  ;;  %v836_v58 = vpop.permute.xlu0 %835 }
 0x354   :  { %391 = vrot.lane.b32.xlu1 %v341_v56, %s1071_s0  ;;  %371 = vrot.lane.b32.xlu0 %v322_v57, %s1071_s0  ;;  %v840_v4 = vsel %vm103_vm4, %v838_v21, %v1200_v26  ;;  %v839_v8 = vsel %vm103_vm4, %v836_v58, %v838_v21 }
 0x357   :  { %v821_v60 = vpop.permute.xlu1 %820  ;;  %v819_v61 = vpop.permute.xlu0 %818 }
 0x358   :  { %379 = vrot.lane.b32.xlu1 %v331_v59, %s1071_s0  ;;  %869 = vrot.lane.b32.xlu0 %v819_v61, %s1071_s0  ;;  %v822_v12 = vsel %vm77_vm6, %v819_v61, %v821_v60 }
 0x35b   :  { %v799_v63 = vpop.permute.xlu1 %798  ;;  %v797_v0 = vpop.permute.xlu0 %796 }
 0x35c   :  { %377 = vrot.lane.b32.xlu1 %v330_v62, %s1071_s0  ;;  %855 = vrot.lane.b32.xlu0 %v799_v63, %s1071_s0  ;;  %v801_v16 = vsel %vm48_vm5, %v797_v0, %v799_v63  ;;  %v800_v30 = vsel %vm48_vm5, %v1220_v47, %v797_v0 }
 0x35f   :  { %v844_v2 = vpop.permute.xlu1 %843  ;;  %v842_v3 = vpop.permute.xlu0 %841 }
 0x360   :  { %887 = vrot.lane.b32.xlu1 %v836_v58, %s1071_s0  ;;  %893 = vrot.lane.b32.xlu0 %v842_v3, %s1071_s0  ;;  %v845_v17 = vsel %vm112_vm9, %v842_v3, %v844_v2  ;;  %v846_v7 = vsel %vm112_vm9, %v844_v2, %v1197_v22 }
 0x363   :  { %v832_v5 = vpop.permute.xlu1 %831  ;;  %v830_v6 = vpop.permute.xlu0 %829 }
 0x364   :  { %873 = vrot.lane.b32.xlu1 %v821_v60, %s1071_s0  ;;  %891 = vrot.lane.b32.xlu0 %v840_v4, %s1071_s0  ;;  %v833_v10 = vsel %vm94_vm10, %v830_v6, %v832_v5  ;;  %v834_v11 = vsel %vm94_vm10, %v832_v5, %v1202_v31 }
 0x367   :  { %v826_v9 = vpop.permute.xlu1 %825  ;;  %v824_v13 = vpop.permute.xlu0 %823 }
 0x368   :  { %889 = vrot.lane.b32.xlu1 %v839_v8, %s1071_s0  ;;  %881 = vrot.lane.b32.xlu0 %v830_v6, %s1071_s0  ;;  %v828_v14 = vsel %vm85_vm11, %v826_v9, %v1204_v32  ;;  %v827_v27 = vsel %vm85_vm11, %v824_v13, %v826_v9 }
 0x36b   :  { %v815_v15 = vpop.permute.xlu1 %814  ;;  %v813_v18 = vpop.permute.xlu0 %812 }
 0x36c   :  { %871 = vrot.lane.b32.xlu0 %v822_v12, %s1071_s0  ;;  %875 = vrot.lane.b32.xlu1 %v824_v13, %s1071_s0  ;;  %v817_v28 = vsel %vm70_vm7, %v813_v18, %v815_v15  ;;  %v816_v32 = vsel %vm70_vm7, %v1210_v40, %v813_v18 }
 0x36f   :  { %v807_v26 = vpop.permute.xlu1 %806  ;;  %v805_v25 = vpop.permute.xlu0 %804 }
 0x370   :  { %867 = vrot.lane.b32.xlu0 %v815_v15, %s1071_s0  ;;  %861 = vrot.lane.b32.xlu1 %v807_v26, %s1071_s0  ;;  %v809_v22 = vsel %vm59_vm8, %v805_v25, %v807_v26  ;;  %v808_v31 = vsel %vm59_vm8, %v1212_v41, %v805_v25  ;;  %v1546_v15 = vld [vmem:[%s1591_s2] sm:$0xff]  ;;  %v413_v26 = vsel %vm169_vm12, %v1326_v19, %v1441_v48 }
 0x374   :  { %895 = vrot.lane.b32.xlu0 %v845_v17, %s1071_s0  ;;  %853 = vrot.lane.b32.xlu1 %v801_v16, %s1071_s0 }
 0x378   :  { %883 = vrot.lane.b32.xlu0 %v833_v10, %s1071_s0  ;;  %897 = vrot.lane.b32.xlu1 %v846_v7, %s1071_s0 }
 0x37c   :  { %879 = vrot.lane.b32.xlu0 %v828_v14, %s1071_s0  ;;  %885 = vrot.lane.b32.xlu1 %v834_v11, %s1071_s0 }
 0x380   :  { %877 = vrot.lane.b32.xlu1 %v827_v27, %s1071_s0  ;;  %859 = vrot.lane.b32.xlu0 %v809_v22, %s1071_s0 }
 0x384   :  { %865 = vrot.lane.b32.xlu1 %v817_v28, %s1071_s0  ;;  %857 = vrot.lane.b32.xlu0 %v808_v31, %s1071_s0 }
 0x388   :  { %863 = vrot.lane.b32.xlu1 %v816_v32, %s1071_s0  ;;  %847 = vrot.lane.b32.xlu0 %v1409_v24, %s1071_s0 }
 0x38c   :  { %851 = vrot.lane.b32.xlu1 %v800_v30, %s1071_s0 }
 0x390   :  { %849 = vrot.lane.b32.xlu1 %v1405_v23, %s1071_s0 }
 0x392   :  { %v384_v41 = vpop.permute.xlu0 %383  ;;  %v402_v33 = vpop.permute.xlu1 %401 }
 0x39a   :  { %v388_v35 = vpop.permute.xlu1 %387 }
 0x39e   :  { %v370_v34 = vpop.permute.xlu0 %369  ;;  %v404_v40 = vpop.permute.xlu1 %403 }
 0x39f   :  { %v427_v55 = vsel %vm169_vm12, %v402_v33, %v404_v40 }
 0x3a2   :  { %v408_v36 = vpop.permute.xlu0 %407  ;;  %v390_v42 = vpop.permute.xlu1 %389 }
 0x3a6   :  { %v406_v37 = vpop.permute.xlu0 %405 }
 0x3a7   :  { %v428_v52 = vsel %vm169_vm12, %v404_v40, %v406_v37 }
 0x3aa   :  { %v396_v38 = vpop.permute.xlu0 %395 }
 0x3ae   :  { %v386_v43 = vpop.permute.xlu0 %385 }
 0x3af   :  { %v422_v60 = vsel %vm169_vm12, %v386_v43, %v388_v35  ;;  %v421_v63 = vsel %vm169_vm12, %v384_v41, %v386_v43 }
 0x3b2   :  { %v376_v29 = vpop.permute.xlu1 %375  ;;  %v382_v24 = vpop.permute.xlu0 %381 }
 0x3b6   :  { %v368_v44 = vpop.permute.xlu1 %367  ;;  %v410_v39 = vpop.permute.xlu0 %409 }
 0x3b7   :  { %v429_v51 = vsel %vm169_vm12, %v408_v36, %v410_v39  ;;  %v416_v12 = vsel %vm169_vm12, %v368_v44, %v370_v34 }
 0x3ba   :  { %v366_v47 = vpop.permute.xlu1 %365  ;;  %v398_v45 = vpop.permute.xlu0 %397 }
 0x3bb   :  { %v425_v56 = vsel %vm169_vm12, %v396_v38, %v398_v45  ;;  %v415_v13 = vsel %vm169_vm12, %v366_v47, %v368_v44 }
 0x3be   :  { %v412_v46 = vpop.permute.xlu1 %411  ;;  %v394_v49 = vpop.permute.xlu0 %393 }
 0x3bf   :  { %v430_v23 = vsel %vm169_vm12, %v410_v39, %v412_v46 }
 0x3c0   :  { %466 = vmatprep.subr.mxu1 %v430_v23 }
 0x3c1   :  { %467 = vmatpush1.msra.mxu1 %v429_v51 }
 0x3c2   :  { %v400_v53 = vpop.permute.xlu1 %399  ;;  %468 = vmatprep.subr.mxu1 %v428_v52  ;;  %v374_v54 = vpop.permute.xlu0 %373 }
 0x3c3   :  { %469 = vmatpush1.msra.mxu1 %v427_v55  ;;  %v426_v20 = vsel %vm169_vm12, %v398_v45, %v400_v53  ;;  %v418_v5 = vsel %vm169_vm12, %v374_v54, %v376_v29 }
 0x3c4   :  { %470 = vmatprep.subr.mxu1 %v426_v20 }
 0x3c5   :  { %471 = vmatpush1.msra.mxu1 %v425_v56 }
 0x3c6   :  { %v392_v57 = vpop.permute.xlu1 %391  ;;  %v372_v21 = vpop.permute.xlu0 %371 }
 0x3c7   :  { %v424_v58 = vsel %vm169_vm12, %v392_v57, %v394_v49  ;;  %v423_v59 = vsel %vm169_vm12, %v390_v42, %v392_v57  ;;  %v417_v6 = vsel %vm169_vm12, %v372_v21, %v374_v54 }
 0x3c8   :  { %472 = vmatprep.subr.mxu1 %v424_v58 }
 0x3c9   :  { %473 = vmatpush1.msra.mxu1 %v423_v59 }
 0x3ca   :  { %v380_v61 = vpop.permute.xlu1 %379  ;;  %474 = vmatprep.subr.mxu1 %v422_v60  ;;  %v870_v62 = vpop.permute.xlu0 %869 }
 0x3cb   :  { %475 = vmatpush1.msra.mxu1 %v421_v63  ;;  %v420_v0 = vsel %vm169_vm12, %v380_v61, %v382_v24 }
 0x3cc   :  { %476 = vmatprep.subr.mxu1 %v420_v0 }
 0x3ce   :  { %v378_v2 = vpop.permute.xlu1 %377  ;;  %v1536_v3 = vpop.permute.xlu0 %855 }
 0x3cf   :  { %v419_v4 = vsel %vm169_vm12, %v378_v2, %v380_v61 }
 0x3d0   :  { %477 = vmatpush1.msra.mxu1 %v419_v4 }
 0x3d1   :  { %478 = vmatprep.subr.mxu1 %v418_v5 }
 0x3d2   :  { %v888_v8 = vpop.permute.xlu1 %887  ;;  %479 = vmatpush1.msra.mxu1 %v417_v6  ;;  %v894_v9 = vpop.permute.xlu0 %893 }
 0x3d3   :  { %480 = vmatprep.subr.mxu1 %v416_v12 }
 0x3d4   :  { %481 = vmatpush1.msra.mxu1 %v415_v13 }
 0x3d5   :  { %482 = vmatprep.subr.mxu1 %v1447_v50 }
 0x3d6   :  { %v874_v16 = vpop.permute.xlu1 %873  ;;  %483 = vmatpush1.msra.mxu1 %v413_v26  ;;  %v892_v17 = vpop.permute.xlu0 %891 }
 0x3d7   :  { %1037 = vmatmul.mubr.msk.f32.vlgmr.msra.gmra.mxu1 %vm206_vm13, %v1546_v15 }
 0x3d8   :  { %999 = vmatprep.mubr.f32.mxu1 %v1062_v1 }
 0x3da   :  { %v890_v18 = vpop.permute.xlu1 %889  ;;  %v882_v7 = vpop.permute.xlu0 %881 }
 0x3db   :  { %v914_v32 = vsel %vm169_vm12, %v890_v18, %v892_v17  ;;  %v913_v1 = vsel %vm169_vm12, %v888_v8, %v890_v18 }
 0x3de   :  { %v876_v10 = vpop.permute.xlu1 %875  ;;  %v872_v11 = vpop.permute.xlu0 %871 }
 0x3df   :  { %v908_v38 = vsel %vm169_vm12, %v872_v11, %v874_v16  ;;  %v907_v42 = vsel %vm169_vm12, %v870_v62, %v872_v11 }
 0x3e2   :  { %v862_v14 = vpop.permute.xlu1 %861  ;;  %v868_v25 = vpop.permute.xlu0 %867 }
 0x3e6   :  { %v854_v27 = vpop.permute.xlu1 %853  ;;  %v896_v50 = vpop.permute.xlu0 %895 }
 0x3e7   :  { %v915_v31 = vsel %vm169_vm12, %v894_v9, %v896_v50  ;;  %v902_v49 = vsel %vm169_vm12, %v854_v27, %v1536_v3 }
 0x3ea   :  { %v898_v22 = vpop.permute.xlu1 %897  ;;  %v884_v28 = vpop.permute.xlu0 %883 }
 0x3eb   :  { %v916_v48 = vsel %vm169_vm12, %v896_v50, %v898_v22  ;;  %v911_v34 = vsel %vm169_vm12, %v882_v7, %v884_v28 }
 0x3ec   :  { %949 = vmatprep.subr.mxu1 %v916_v48 }
 0x3ed   :  { %950 = vmatpush1.msra.mxu1 %v915_v31 }
 0x3ee   :  { %v886_v30 = vpop.permute.xlu1 %885  ;;  %951 = vmatprep.subr.mxu1 %v914_v32  ;;  %v880_v41 = vpop.permute.xlu0 %879 }
 0x3ef   :  { %952 = vmatpush1.msra.mxu1 %v913_v1  ;;  %v912_v33 = vsel %vm169_vm12, %v884_v28, %v886_v30 }
 0x3f0   :  { %953 = vmatprep.subr.mxu1 %v912_v33 }
 0x3f1   :  { %954 = vmatpush1.msra.mxu1 %v911_v34 }
 0x3f2   :  { %v878_v35 = vpop.permute.xlu1 %877  ;;  %v860_v40 = vpop.permute.xlu0 %859 }
 0x3f3   :  { %v909_v36 = vsel %vm169_vm12, %v876_v10, %v878_v35  ;;  %v910_v37 = vsel %vm169_vm12, %v878_v35, %v880_v41  ;;  %v904_v47 = vsel %vm169_vm12, %v860_v40, %v862_v14 }
 0x3f4   :  { %955 = vmatprep.subr.mxu1 %v910_v37 }
 0x3f5   :  { %956 = vmatpush1.msra.mxu1 %v909_v36 }
 0x3f6   :  { %v866_v43 = vpop.permute.xlu1 %865  ;;  %957 = vmatprep.subr.mxu1 %v908_v38  ;;  %v858_v24 = vpop.permute.xlu0 %857 }
 0x3f7   :  { %958 = vmatpush1.msra.mxu1 %v907_v42  ;;  %v906_v29 = vsel %vm169_vm12, %v866_v43, %v868_v25  ;;  %v903_v45 = vsel %vm169_vm12, %v858_v24, %v860_v40 }
 0x3f8   :  { %959 = vmatprep.subr.mxu1 %v906_v29 }
 0x3fa   :  { %v864_v44 = vpop.permute.xlu1 %863  ;;  %v848_v51 = vpop.permute.xlu0 %847 }
 0x3fb   :  { %v905_v39 = vsel %vm169_vm12, %v864_v44, %v866_v43  ;;  %v899_v54 = vsel %vm169_vm12, %v1326_v19, %v848_v51 }
 0x3fc   :  { %960 = vmatpush1.msra.mxu1 %v905_v39 }
 0x3fd   :  { %961 = vmatprep.subr.mxu1 %v904_v47 }
 0x3fe   :  { %v852_v46 = vpop.permute.xlu1 %851  ;;  %962 = vmatpush1.msra.mxu1 %v903_v45 }
 0x3ff   :  { %v901_v23 = vsel %vm169_vm12, %v852_v46, %v854_v27  ;;  %963 = vmatprep.subr.mxu1 %v902_v49 }
 0x400   :  { %964 = vmatpush1.msra.mxu1 %v901_v23 }
 0x402   :  { %v850_v52 = vpop.permute.xlu1 %849 }
 0x403   :  { %v900_v53 = vsel %vm169_vm12, %v848_v51, %v850_v52 }
 0x404   :  { %965 = vmatprep.subr.mxu1 %v900_v53 }
 0x405   :  { %966 = vmatpush1.msra.mxu1 %v899_v54 }
 0x406   :  { %1041 = vmatmul.mubr.msk.f32.vlgmr.msra.gmra.mxu1 %vm206_vm13, %v1546_v15 }
 0x497   :  { %v518_v55 = vpop.f32.mrf.mxu1 }
 0x498   :  { %v527_v20 = vmul.f32 %v518_v55, %v518_v55 }
 0x499   :  { %v520_v56 = vpop.f32.mrf.mxu1 }
 0x49a   :  { %v523_v57 = vadd.f32 %v520_v56, %v518_v55  ;;  %v528_v21 = vmul.f32 %v520_v56, %v520_v56 }
 0x49c   :  { %524 = vadd.xlane.f32.xlu0 %v523_v57  ;;  %v529_v58 = vadd.f32 %v528_v21, %v527_v20 }
 0x4a0   :  { %530 = vadd.xlane.f32.xlu0 %v529_v58 }
 0x4c6   :  { %v1001_v59 = vpop.f32.mrf.mxu1 }
 0x4c7   :  { %v1010_v61 = vmul.f32 %v1001_v59, %v1001_v59 }
 0x4c8   :  { %v1003_v60 = vpop.f32.mrf.mxu1 }
 0x4c9   :  { %v1006_v62 = vadd.f32 %v1003_v60, %v1001_v59  ;;  %v1011_v63 = vmul.f32 %v1003_v60, %v1003_v60 }
 0x4cb   :  { %v1012_v0 = vadd.f32 %v1011_v63, %v1010_v61  ;;  %1007 = vadd.xlane.f32.xlu1 %v1006_v62 }
 0x4cd   :  { %1013 = vadd.xlane.f32.xlu0 %v1012_v0 }
 0x525   :  { %v525_v19 = vpop.xlane.xlu0 %524 }
 0x526   :  { %v526_v2 = vmul.f32 0.00390625, %v525_v19 }
 0x528   :  { %v533_v3 = vmul.f32 %v526_v2, %v526_v2  ;;  %v536_v12 = vsub.f32 %v518_v55, %v526_v2  ;;  %v537_v13 = vsub.f32 %v520_v56, %v526_v2 }
 0x529   :  { %v531_v4 = vpop.xlane.xlu0 %530 }
 0x52a   :  { %v532_v5 = vmul.f32 0.00390625, %v531_v4 }
 0x52c   :  { %v534_v6 = vsub.f32 %v532_v5, %v533_v3 }
 0x52e   :  { %v535_v8 = vmax.f32 %v534_v6, 0.0 }
 0x530   :  { %v538_v9 = vadd.f32 1e-05, %v535_v8 }
 0x532   :  { %1058 = vrsqrt.f32 %v538_v9 }
 0x53f   :  { %v1059_v15 = vpop.eup %1058 }
 0x540   :  { %v540_v26 = vmul.f32 %v1059_v15, %v536_v12  ;;  %v541_v16 = vmul.f32 %v1059_v15, %v537_v13 }
 0x542   :  { %v542_v17 = vmul.f32 0.2, %v540_v26  ;;  %v543_v18 = vmul.f32 0.2, %v541_v16 }
 0x544   :  { %v544_v7 = vmax.f32 %v540_v26, %v542_v17  ;;  %v545_v10 = vmax.f32 %v541_v16, %v543_v18 }
 0x546   :  { %546 = vst [vmem:[%s1592_s3] sm:$0xff] %v544_v7  ;;  %547 = vst [vmem:[%s1592_s3 + $0x8] sm:$0xff] %v545_v10 }
 0x554   :  { %v1008_v11 = vpop.xlane.xlu1 %1007 }
 0x555   :  { %v1009_v14 = vmul.f32 0.00390625, %v1008_v11 }
 0x556   :  { %v1014_v25 = vpop.xlane.xlu0 %1013 }
 0x557   :  { %v1016_v27 = vmul.f32 %v1009_v14, %v1009_v14  ;;  %v1015_v50 = vmul.f32 0.00390625, %v1014_v25  ;;  %v1019_v31 = vsub.f32 %v1001_v59, %v1009_v14  ;;  %v1020_v32 = vsub.f32 %v1003_v60, %v1009_v14 }
 0x559   :  { %v1017_v22 = vsub.f32 %v1015_v50, %v1016_v27 }
 0x55b   :  { %v1018_v28 = vmax.f32 %v1017_v22, 0.0 }
 0x55d   :  { %v1021_v48 = vadd.f32 1e-05, %v1018_v28 }
 0x55f   :  { %1060 = vrsqrt.f32 %v1021_v48 }
 0x56c   :  { %v1061_v1 = vpop.eup %1060 }
 0x56d   :  { %v1023_v30 = vmul.f32 %v1061_v1, %v1019_v31  ;;  %v1024_v41 = vmul.f32 %v1061_v1, %v1020_v32 }
 0x56f   :  { %v1025_v33 = vmul.f32 0.2, %v1023_v30  ;;  %v1026_v34 = vmul.f32 0.2, %v1024_v41 }
 0x571   :  { %v1027_v35 = vmax.f32 %v1023_v30, %v1025_v33  ;;  %v1028_v36 = vmax.f32 %v1024_v41, %v1026_v34 }
 0x573   :  { %1042 = vst [vmem:[%s1592_s3 + $0x10] sm:$0xff] %v1027_v35  ;;  %1043 = vst [vmem:[%s1592_s3 + $0x18] sm:$0xff] %v1028_v36 }

</bundles_post_ra>
